<compile_context>
chip_gen: v7x
topology: tpu7x:2x2x1
jax: 0.10.0
libtpu: 0.0.40
codegen_flags: <defaults>
</compile_context>

<pallas_src>
import functools

import jax
import jax.numpy as jnp
from jax.experimental import pallas as pl
from jax.experimental.pallas import tpu as pltpu


# ---------------------------------------------------------------------------
# Fused Pallas kernel: large-kernel stem + surrogate backbone + GAP + head
# ---------------------------------------------------------------------------

def _fused_forward_kernel(patches_ref, w_lk_ref, w_bb_ref, b_bb_ref,
                          avg_ref, w_head_ref, b_head_ref, out_ref):
    """All-matmul fused forward.

    patches_ref: (B*HW, Cin*KH*KW) bf16  im2col patches of the input
    w_lk_ref:    (Cin*KH*KW, 32)   bf16  block-diag debiased large-kernel W
    w_bb_ref:    (32, F)           bf16  surrogate backbone pointwise conv
    b_bb_ref:    (1, F)            f32   backbone bias
    avg_ref:     (B, B*HW)         bf16  block-diag 1/HW averaging matrix
    w_head_ref:  (F, 128)          bf16  classifier, zero-padded to 128 lanes
    b_head_ref:  (1, 128)          f32   classifier bias, zero-padded
    out_ref:     (B, 128)          f32   padded logits
    """
    # Large-kernel debiased conv as one MXU matmul -> (B*HW, 32)
    stem = jnp.dot(patches_ref[...], w_lk_ref[...],
                   preferred_element_type=jnp.float32)
    # Surrogate backbone: pointwise conv + bias + ReLU -> (B*HW, F)
    acts = jnp.dot(stem.astype(jnp.bfloat16), w_bb_ref[...],
                   preferred_element_type=jnp.float32)
    acts = jnp.maximum(acts + b_bb_ref[...], 0.0)
    # Global average pool as an MXU matmul -> (B, F)
    feat = jnp.dot(avg_ref[...], acts.astype(jnp.bfloat16),
                   preferred_element_type=jnp.float32)
    # Classifier head, lane-dense 128-wide output -> (B, 128)
    out_ref[...] = (jnp.dot(feat.astype(jnp.bfloat16), w_head_ref[...],
                            preferred_element_type=jnp.float32)
                    + b_head_ref[...])


# ---------------------------------------------------------------------------
# XLA-side glue: im2col for the large kernel ("same" conv, odd KH/KW)
# ---------------------------------------------------------------------------

def _im2col_large(x, kh, kw):
    """x: (B, Cin, H, W) f32 -> patches (B*H*W, Cin*kh*kw), row layout
    [cin-major, (kh, kw)-minor], matching the block-diagonal weight layout."""
    B, Cin, H, W = x.shape
    ph, pw = kh // 2, kw // 2
    xp = jnp.pad(x, ((0, 0), (0, 0), (ph, ph), (pw, pw)))
    cols = []
    for di in range(kh):
        for dj in range(kw):
            cols.append(xp[:, :, di:di + H, dj:dj + W])
    p = jnp.stack(cols, axis=-1)              # (B, Cin, H, W, kh*kw)
    p = jnp.transpose(p, (0, 2, 3, 1, 4))     # (B, H, W, Cin, kh*kw)
    return p.reshape(B * H * W, Cin * kh * kw)


# ---------------------------------------------------------------------------
# jitted forward (single XLA program: im2col glue + one pallas_call)
# ---------------------------------------------------------------------------

@functools.partial(jax.jit, static_argnames=("kh", "kw", "num_classes"))
def _forward(x, w_lk, w_bb, b_bb, w_head, b_head, *, kh, kw, num_classes):
    B, Cin, H, W = x.shape
    HW = H * W
    patches = _im2col_large(x.astype(jnp.float32), kh, kw).astype(jnp.bfloat16)
    BHW, KIN = patches.shape
    C_STEM = w_lk.shape[1]
    F = w_bb.shape[1]
    OUTP = w_head.shape[1]

    # Block-diagonal averaging matrix for GAP-on-MXU (1/HW is exact in bf16).
    avg = jnp.where(jnp.arange(BHW)[None, :] // HW == jnp.arange(B)[:, None],
                    1.0 / HW, 0.0).astype(jnp.bfloat16)

    flops = int(2 * BHW * KIN * C_STEM + 2 * BHW * C_STEM * F
                + 2 * B * BHW * F + 2 * B * F * OUTP)
    bytes_accessed = int(patches.size * 2 + w_lk.size * 2 + w_bb.size * 2
                         + b_bb.size * 4 + avg.size * 2 + w_head.size * 2
                         + b_head.size * 4 + B * OUTP * 4)

    out = pl.pallas_call(
        _fused_forward_kernel,
        out_shape=jax.ShapeDtypeStruct((B, OUTP), jnp.float32),
        grid_spec=pltpu.PrefetchScalarGridSpec(
            num_scalar_prefetch=0,
            grid=(1,),
            in_specs=[
                pl.BlockSpec((BHW, KIN), lambda i: (0, 0)),
                pl.BlockSpec((KIN, C_STEM), lambda i: (0, 0)),
                pl.BlockSpec((C_STEM, F), lambda i: (0, 0)),
                pl.BlockSpec((1, F), lambda i: (0, 0)),
                pl.BlockSpec((B, BHW), lambda i: (0, 0)),
                pl.BlockSpec((F, OUTP), lambda i: (0, 0)),
                pl.BlockSpec((1, OUTP), lambda i: (0, 0)),
            ],
            out_specs=pl.BlockSpec((B, OUTP), lambda i: (0, 0)),
        ),
        compiler_params=pltpu.CompilerParams(
            dimension_semantics=("arbitrary",)),
        cost_estimate=pl.CostEstimate(
            flops=flops, transcendentals=0, bytes_accessed=bytes_accessed),
    )(patches, w_lk, w_bb, b_bb, avg, w_head, b_head)

    logits = out[:, :num_classes]     # drop zero-padded lanes
    return logits[:, 0]               # matches `self.net(x)[:, 0]`


# ---------------------------------------------------------------------------
# Wrapper holding deterministic surrogate parameters
# ---------------------------------------------------------------------------

class CustomModelLargeKernelNoAvgPoolPallas:
    def __init__(self, in_chans=2, size_w=9, num_classes=8,
                 num_features=128, seed=0):
        assert size_w % 2 == 1, "size_w must be odd for 'same' padding"
        self.kh, self.kw = 31, size_w          # _H = 31, _W = cfg.size_w
        self.c_per_in = 16                     # _C = conv_in_chans // 2
        self.in_chans = in_chans
        self.c_stem = in_chans * self.c_per_in  # == conv_in_chans (32)
        self.num_classes = num_classes
        F = num_features
        OUT_PAD = 128                          # lane-dense padded head width
        assert 1 <= num_classes <= OUT_PAD

        key = jax.random.PRNGKey(seed)
        k = jax.random.split(key, 6)
        khkw = self.kh * self.kw

        # ---- LargeKernel_debias weights (in_channels=1 -> 16), debiased ----
        scale_lk = 1.0 / jnp.sqrt(jnp.float32(khkw))
        w = jax.random.normal(k[0], (self.c_per_in, self.kh, self.kw),
                              jnp.float32) * scale_lk
        absw = jnp.abs(w)
        target = absw / absw.sum((-2, -1), keepdims=True)
        w_eff = w - w.sum((-2, -1), keepdims=True) * target     # debias
        w_mat = w_eff.reshape(self.c_per_in, khkw).T             # (khkw, 16)
        # Block-diagonal over input channels -> (Cin*khkw, Cin*16); zero
        # off-diagonal blocks keep the single-matmul stem exact.
        w_blk = jnp.zeros((in_chans * khkw, self.c_stem), jnp.float32)
        for c in range(in_chans):
            w_blk = w_blk.at[c * khkw:(c + 1) * khkw,
                             c * self.c_per_in:(c + 1) * self.c_per_in].set(w_mat)
        self.w_lk = w_blk.astype(jnp.bfloat16)

        # ---- surrogate backbone: pointwise conv (32 -> F) + ReLU + GAP -----
        scale_bb = 1.0 / jnp.sqrt(jnp.float32(self.c_stem))
        self.w_bb = (jax.random.normal(k[1], (self.c_stem, F), jnp.float32)
                     * scale_bb).astype(jnp.bfloat16)
        self.b_bb = (jax.random.normal(k[2], (1, F), jnp.float32) * scale_bb)

        # ---- classifier head, zero-padded to 128 output lanes --------------
        scale_h = 1.0 / jnp.sqrt(jnp.float32(F))
        w_head = jax.random.normal(k[3], (F, num_classes), jnp.float32) * scale_h
        b_head = jax.random.normal(k[4], (num_classes,), jnp.float32) * scale_h
        w_head_pad = jnp.zeros((F, OUT_PAD), jnp.float32).at[:, :num_classes].set(w_head)
        b_head_pad = jnp.zeros((1, OUT_PAD), jnp.float32).at[0, :num_classes].set(b_head)
        self.w_head = w_head_pad.astype(jnp.bfloat16)
        self.b_head = b_head_pad

    def __call__(self, x_nchw):
        assert x_nchw.shape[1] == self.in_chans
        return _forward(x_nchw, self.w_lk, self.w_bb, self.b_bb,
                        self.w_head, self.b_head,
                        kh=self.kh, kw=self.kw, num_classes=self.num_classes)


# ---------------------------------------------------------------------------
# Demo
# ---------------------------------------------------------------------------

if __name__ == "__main__":
    key = jax.random.PRNGKey(0)
    B, C, H, W = 2, 2, 16, 16                  # small NCHW input (2 detectors)
    x = jax.random.normal(key, (B, C, H, W), jnp.float32)

    model = CustomModelLargeKernelNoAvgPoolPallas(
        in_chans=C, size_w=9, num_classes=8, num_features=128, seed=0)
    y = model(x)
    jax.block_until_ready(y)

    assert y.shape == (B,)
    assert bool(jnp.all(jnp.isfinite(y)))
    print("KERNEL_OK")
</pallas_src>

<mosaic_0001>
module attributes {stable_mosaic.version = 11 : i64} {
  func.func @_fused_forward_kernel(%arg0: i32, %arg1: memref<512x558xbf16, #tpu.memory_space<vmem>>, %arg2: memref<558x32xbf16, #tpu.memory_space<vmem>>, %arg3: memref<32x128xbf16, #tpu.memory_space<vmem>>, %arg4: memref<1x128xf32, #tpu.memory_space<vmem>>, %arg5: memref<2x512xbf16, #tpu.memory_space<vmem>>, %arg6: memref<128x128xbf16, #tpu.memory_space<vmem>>, %arg7: memref<1x128xf32, #tpu.memory_space<vmem>>, %arg8: memref<2x128xf32, #tpu.memory_space<vmem>>) attributes {dimension_semantics = [#tpu.dimension_semantics<arbitrary>], iteration_bounds = array<i64: 1>, scalar_prefetch = 0 : i64, scratch_operands = 0 : i64, tpu.core_type = #tpu.core_type<tc>, window_params = [{pipeline_mode = #tpu.pipeline_mode<synchronous>, transform_indices = @transform_0, window_bounds = array<i64: 512, 558>}, {pipeline_mode = #tpu.pipeline_mode<synchronous>, transform_indices = @transform_1, window_bounds = array<i64: 558, 32>}, {pipeline_mode = #tpu.pipeline_mode<synchronous>, transform_indices = @transform_2, window_bounds = array<i64: 32, 128>}, {pipeline_mode = #tpu.pipeline_mode<synchronous>, transform_indices = @transform_3, window_bounds = array<i64: 1, 128>}, {pipeline_mode = #tpu.pipeline_mode<synchronous>, transform_indices = @transform_4, window_bounds = array<i64: 2, 512>}, {pipeline_mode = #tpu.pipeline_mode<synchronous>, transform_indices = @transform_5, window_bounds = array<i64: 128, 128>}, {pipeline_mode = #tpu.pipeline_mode<synchronous>, transform_indices = @transform_6, window_bounds = array<i64: 1, 128>}, {pipeline_mode = #tpu.pipeline_mode<synchronous>, transform_indices = @transform_7, window_bounds = array<i64: 2, 128>}]} {
    %c0 = arith.constant 0 : index
    %c0_0 = arith.constant 0 : index
    %0 = vector.load %arg1[%c0, %c0_0] : memref<512x558xbf16, #tpu.memory_space<vmem>>, vector<512x558xbf16>
    %c0_1 = arith.constant 0 : index
    %c0_2 = arith.constant 0 : index
    %1 = vector.load %arg2[%c0_1, %c0_2] : memref<558x32xbf16, #tpu.memory_space<vmem>>, vector<558x32xbf16>
    %cst = arith.constant dense<0.000000e+00> : vector<512x32xf32>
    %2 = tpu.matmul %0, %1, %cst {dimension_numbers = #tpu.dot_dimension_numbers<[1], [0], [0], [1], [0, 0, 1, 1], [], []>} : vector<512x558xbf16>, vector<558x32xbf16>, vector<512x32xf32> -> vector<512x32xf32>
    %3 = arith.truncf %2 : vector<512x32xf32> to vector<512x32xbf16>
    %c0_3 = arith.constant 0 : index
    %c0_4 = arith.constant 0 : index
    %4 = vector.load %arg3[%c0_3, %c0_4] : memref<32x128xbf16, #tpu.memory_space<vmem>>, vector<32x128xbf16>
    %cst_5 = arith.constant dense<0.000000e+00> : vector<512x128xf32>
    %5 = tpu.matmul %3, %4, %cst_5 {dimension_numbers = #tpu.dot_dimension_numbers<[1], [0], [0], [1], [0, 0, 1, 1], [], []>} : vector<512x32xbf16>, vector<32x128xbf16>, vector<512x128xf32> -> vector<512x128xf32>
    %c0_6 = arith.constant 0 : index
    %c0_7 = arith.constant 0 : index
    %6 = vector.load %arg4[%c0_6, %c0_7] : memref<1x128xf32, #tpu.memory_space<vmem>>, vector<1x128xf32>
    %7 = vector.broadcast %6 : vector<1x128xf32> to vector<512x128xf32>
    %8 = arith.addf %5, %7 : vector<512x128xf32>
    %cst_8 = arith.constant 0.000000e+00 : f32
    %9 = vector.broadcast %cst_8 : f32 to vector<512x128xf32>
    %10 = arith.maximumf %8, %9 : vector<512x128xf32>
    %c0_9 = arith.constant 0 : index
    %c0_10 = arith.constant 0 : index
    %11 = vector.load %arg5[%c0_9, %c0_10] : memref<2x512xbf16, #tpu.memory_space<vmem>>, vector<2x512xbf16>
    %12 = arith.truncf %10 : vector<512x128xf32> to vector<512x128xbf16>
    %cst_11 = arith.constant dense<0.000000e+00> : vector<2x128xf32>
    %13 = tpu.matmul %11, %12, %cst_11 {dimension_numbers = #tpu.dot_dimension_numbers<[1], [0], [0], [1], [0, 0, 1, 1], [], []>} : vector<2x512xbf16>, vector<512x128xbf16>, vector<2x128xf32> -> vector<2x128xf32>
    %14 = arith.truncf %13 : vector<2x128xf32> to vector<2x128xbf16>
    %c0_12 = arith.constant 0 : index
    %c0_13 = arith.constant 0 : index
    %15 = vector.load %arg6[%c0_12, %c0_13] : memref<128x128xbf16, #tpu.memory_space<vmem>>, vector<128x128xbf16>
    %cst_14 = arith.constant dense<0.000000e+00> : vector<2x128xf32>
    %16 = tpu.matmul %14, %15, %cst_14 {dimension_numbers = #tpu.dot_dimension_numbers<[1], [0], [0], [1], [0, 0, 1, 1], [], []>} : vector<2x128xbf16>, vector<128x128xbf16>, vector<2x128xf32> -> vector<2x128xf32>
    %c0_15 = arith.constant 0 : index
    %c0_16 = arith.constant 0 : index
    %17 = vector.load %arg7[%c0_15, %c0_16] : memref<1x128xf32, #tpu.memory_space<vmem>>, vector<1x128xf32>
    %18 = vector.broadcast %17 : vector<1x128xf32> to vector<2x128xf32>
    %19 = arith.addf %16, %18 : vector<2x128xf32>
    %c0_17 = arith.constant 0 : index
    %c0_18 = arith.constant 0 : index
    %20 = vector.load %arg8[%c0_17, %c0_18] : memref<2x128xf32, #tpu.memory_space<vmem>>, vector<2x128xf32>
    tpu.vector_store %arg8[%c0_17, %c0_18], %19 {strides = array<i32>} : memref<2x128xf32, #tpu.memory_space<vmem>>, vector<2x128xf32>,
    return
  }
  func.func @transform_0(%arg0: i32) -> (i32, i32) {
    %c0_i32 = arith.constant 0 : i32
    %c0_i32_0 = arith.constant 0 : i32
    %c0_i32_1 = arith.constant 0 : i32
    return %c0_i32, %c0_i32_0 : i32, i32
  }
  func.func @transform_1(%arg0: i32) -> (i32, i32) {
    %c0_i32 = arith.constant 0 : i32
    %c0_i32_0 = arith.constant 0 : i32
    %c0_i32_1 = arith.constant 0 : i32
    return %c0_i32, %c0_i32_0 : i32, i32
  }
  func.func @transform_2(%arg0: i32) -> (i32, i32) {
    %c0_i32 = arith.constant 0 : i32
    %c0_i32_0 = arith.constant 0 : i32
    %c0_i32_1 = arith.constant 0 : i32
    return %c0_i32, %c0_i32_0 : i32, i32
  }
  func.func @transform_3(%arg0: i32) -> (i32, i32) {
    %c0_i32 = arith.constant 0 : i32
    %c0_i32_0 = arith.constant 0 : i32
    %c0_i32_1 = arith.constant 0 : i32
    return %c0_i32, %c0_i32_0 : i32, i32
  }
  func.func @transform_4(%arg0: i32) -> (i32, i32) {
    %c0_i32 = arith.constant 0 : i32
    %c0_i32_0 = arith.constant 0 : i32
    %c0_i32_1 = arith.constant 0 : i32
    return %c0_i32, %c0_i32_0 : i32, i32
  }
  func.func @transform_5(%arg0: i32) -> (i32, i32) {
    %c0_i32 = arith.constant 0 : i32
    %c0_i32_0 = arith.constant 0 : i32
    %c0_i32_1 = arith.constant 0 : i32
    return %c0_i32, %c0_i32_0 : i32, i32
  }
  func.func @transform_6(%arg0: i32) -> (i32, i32) {
    %c0_i32 = arith.constant 0 : i32
    %c0_i32_0 = arith.constant 0 : i32
    %c0_i32_1 = arith.constant 0 : i32
    return %c0_i32, %c0_i32_0 : i32, i32
  }
  func.func @transform_7(%arg0: i32) -> (i32, i32) {
    %c0_i32 = arith.constant 0 : i32
    %c0_i32_0 = arith.constant 0 : i32
    %c0_i32_1 = arith.constant 0 : i32
    return %c0_i32, %c0_i32_0 : i32, i32
  }
}

</mosaic_0001>

<bundles_post_ra>
// kernel: _forward.1
= control target key start
LH: loop header
LB: loop body
LE: loop exit
PB: predicated region body
PF: predicated region fallthrough
CT: control target
= control target key end

     0   :  { %v3994_v0 = vmov 0   ;;  %vm1395_vm0 = vcmask 1046528   ;;  %vm1298_vm1 = vcmask 375808   ;;  %vm2321_vm2 = vcmask 261120   ;;  %s5155_s1 = inlined_call_operand.vmem [shape: bf16[558,32], index: 1, kind: input, shape index: {}]   ;;  %s5156_s0 = inlined_call_operand.vmem [shape: bf16[512,558], index: 0, kind: input, shape index: {}]   ;;  %s5157_s2 = inlined_call_operand.vmem [shape: bf16[32,128], index: 2, kind: input, shape index: {}]   ;;  %s5158_s3 = inlined_call_operand.vmem [shape: f32[1,128], index: 3, kind: input, shape index: {}]   ;;  %s5159_s4 = inlined_call_operand.vmem [shape: bf16[2,512], index: 4, kind: input, shape index: {}]   ;;  %s5160_s5 = inlined_call_operand.vmem [shape: bf16[128,128], index: 5, kind: input, shape index: {}]   ;;  %s5161_s6 = inlined_call_operand.vmem [shape: f32[1,128], index: 6, kind: input, shape index: {}]   ;;  %s5162_s7 = inlined_call_operand.vmem [shape: f32[2,128], index: 7, kind: output, shape index: {}]  }
   0x1   :  { %1399 = vmatprep.subr.bf16.mxu0 %v3994_v0  ;;  %v3725_v1 = vld [vmem:[%s5155_s1] sm:$0xff]   ;;  %3582 = vmatprep.subr.bf16.mxu1 %v3994_v0  ;;  %v3726_v2 = vld [vmem:[%s5155_s1 + $0x8] sm:$0xff]   ;;  %v3727_v3 = vld [vmem:[%s5155_s1 + $0x10] sm:$0xff]   ;;  %vm3997_vm3 = vmmov 0  }
   0x2   :  { %1400 = vmatpush1.bf16.msra.mxu0 %v3725_v1  ;;  %3598 = vmatpush1.bf16.msra.mxu1 %v3725_v1  ;;  %v3728_v4 = vld [vmem:[%s5155_s1 + $0x18] sm:$0xff]   ;;  %v3729_v5 = vld [vmem:[%s5155_s1 + $0x20] sm:$0xff]   ;;  %v3730_v7 = vld [vmem:[%s5155_s1 + $0x28] sm:$0xff]  }
   0x3   :  { %1401 = vmatprep.subr.bf16.mxu0 %v3994_v0  ;;  %3583 = vmatprep.subr.bf16.mxu1 %v3994_v0  ;;  %v3743_v6 = vld [vmem:[%s5156_s0 + $0x4] ss:$20 sps:$4 sm:$0xff]   ;;  %v3731_v8 = vld [vmem:[%s5155_s1 + $0x30] sm:$0xff]   ;;  %v3734_v11 = vld [vmem:[%s5155_s1 + $0x48] sm:$0xff]  }
   0x4   :  { %1431 = vmatprep.mubr.bf16.mxu0 %v3743_v6  ;;  %v3732_v9 = vld [vmem:[%s5155_s1 + $0x38] sm:$0xff]   ;;  %v3733_v10 = vld [vmem:[%s5155_s1 + $0x40] sm:$0xff]   ;;  %v3735_v12 = vld [vmem:[%s5155_s1 + $0x50] sm:$0xff]  }
   0x5   :  { %v3781_v13 = vld [vmem:[%s5156_s0 + $0x34c] ss:$20 sps:$4 sm:$0xff]   ;;  %v3736_v14 = vld [vmem:[%s5155_s1 + $0x58] sm:$0xff]   ;;  %v3739_v17 = vld [vmem:[%s5155_s1 + $0x70] sm:$0xff]  }
   0x6   :  { %1402 = vmatpush1.bf16.msra.mxu0 %v3726_v2  ;;  %3599 = vmatpush1.bf16.msra.mxu1 %v3726_v2  ;;  %v3737_v15 = vld [vmem:[%s5155_s1 + $0x60] sm:$0xff]   ;;  %v3738_v16 = vld [vmem:[%s5155_s1 + $0x68] sm:$0xff]   ;;  %v3740_v18 = vld [vmem:[%s5155_s1 + $0x78] sm:$0xff]  }
   0x7   :  { %1403 = vmatprep.subr.bf16.mxu0 %v3994_v0  ;;  %3584 = vmatprep.subr.bf16.mxu1 %v3994_v0  ;;  %v3741_v19 = vld [vmem:[%s5156_s0] ss:$20 sps:$4 sm:$0xff]   ;;  %v3779_v22 = vld [vmem:[%s5156_s0 + $0x348] ss:$20 sps:$4 sm:$0xff]   ;;  %v3790_v26 = vld [vmem:[%s5156_s0 + $0x370] ss:$20 sps:$4 sm:$0xff]  }
   0x8   :  { %1599 = vmatprep.mubr.bf16.mxu1 %v3781_v13  ;;  %v3744_v20 = vld [vmem:[%s5155_s1 + $0x80] sm:$0xff]   ;;  %v3786_v23 = vld [vmem:[%s5156_s0 + $0x374] ss:$20 sps:$4 sm:$0xff]   ;;  %v3792_v29 = vld [vmem:[%s5156_s0 + $0x39c] ss:$20 sps:$4 sm:$0xff]  }
   0x9   :  { %v3745_v21 = vld [vmem:[%s5156_s0 + $0x2c] ss:$20 sps:$4 sm:$0xff]   ;;  %v3747_v25 = vld [vmem:[%s5156_s0 + $0x28] ss:$20 sps:$4 sm:$0xff]   ;;  %v3752_v28 = vld [vmem:[%s5155_s1 + $0x90] sm:$0xff]  }
   0xa   :  { %1404 = vmatpush1.bf16.msra.mxu0 %v3727_v3  ;;  %3600 = vmatpush1.bf16.msra.mxu1 %v3727_v3  ;;  %v3748_v24 = vld [vmem:[%s5155_s1 + $0x88] sm:$0xff]   ;;  %v3759_v30 = vld [vmem:[%s5155_s1 + $0x98] sm:$0xff]   ;;  %v3751_v31 = vld [vmem:[%s5156_s0 + $0x50] ss:$20 sps:$4 sm:$0xff]  }
   0xb   :  { %1405 = vmatprep.subr.bf16.mxu0 %v3994_v0  ;;  %3585 = vmatprep.subr.bf16.mxu1 %v3994_v0  ;;  %v3749_v27 = vld [vmem:[%s5156_s0 + $0x54] ss:$20 sps:$4 sm:$0xff]   ;;  %v3796_v32 = vld [vmem:[%s5156_s0 + $0x398] ss:$20 sps:$4 sm:$0xff]   ;;  %v3753_v33 = vld [vmem:[%s5156_s0 + $0x7c] ss:$20 sps:$4 sm:$0xff]  }
   0xc   :  { %v3763_v34 = vld [vmem:[%s5155_s1 + $0xa0] sm:$0xff]   ;;  %v3767_v36 = vld [vmem:[%s5155_s1 + $0xa8] sm:$0xff]   ;;  %v3774_v40 = vld [vmem:[%s5155_s1 + $0xb0] sm:$0xff]  }
   0xd   :  { %v3799_v35 = vld [vmem:[%s5156_s0 + $0x3c4] ss:$20 sps:$4 sm:$0xff]   ;;  %v3803_v38 = vld [vmem:[%s5156_s0 + $0x3c0] ss:$20 sps:$4 sm:$0xff]   ;;  %v3853_v44 = vld [vmem:[%s5155_s1 + $0x108] sm:$0xff]  }
   0xe   :  { %1406 = vmatpush1.bf16.msra.mxu0 %v3728_v4  ;;  %3601 = vmatpush1.bf16.msra.mxu1 %v3728_v4  ;;  %v3755_v37 = vld [vmem:[%s5156_s0 + $0x78] ss:$20 sps:$4 sm:$0xff]   ;;  %v3846_v42 = vld [vmem:[%s5155_s1 + $0x100] sm:$0xff]   ;;  %v3810_v46 = vld [vmem:[%s5156_s0 + $0x3e8] ss:$20 sps:$4 sm:$0xff]  }
   0xf   :  { %1407 = vmatprep.subr.bf16.mxu0 %v3994_v0  ;;  %3586 = vmatprep.subr.bf16.mxu1 %v3994_v0  ;;  %v3756_v39 = vld [vmem:[%s5156_s0 + $0xa4] ss:$20 sps:$4 sm:$0xff]   ;;  %v3806_v41 = vld [vmem:[%s5156_s0 + $0x3ec] ss:$20 sps:$4 sm:$0xff]   ;;  %v3813_v49 = vld [vmem:[%s5156_s0 + $0x414] ss:$20 sps:$4 sm:$0xff]  }
  0x10   :  { %v3778_v43 = vld [vmem:[%s5155_s1 + $0xb8] sm:$0xff]   ;;  %v3758_v45 = vld [vmem:[%s5156_s0 + $0xa0] ss:$20 sps:$4 sm:$0xff]   ;;  %v3798_v51 = vld [vmem:[%s5155_s1 + $0xc8] sm:$0xff]  }
  0x11   :  { %v3760_v47 = vld [vmem:[%s5156_s0 + $0xcc] ss:$20 sps:$4 sm:$0xff]   ;;  %v3855_v50 = vld [vmem:[%s5155_s1 + $0x110] sm:$0x7f]   ;;  %v3762_v52 = vld [vmem:[%s5156_s0 + $0xc8] ss:$20 sps:$4 sm:$0xff]  }
  0x12   :  { %1408 = vmatpush1.bf16.msra.mxu0 %v3729_v5  ;;  %3602 = vmatpush1.bf16.msra.mxu1 %v3729_v5  ;;  %v3785_v48 = vld [vmem:[%s5155_s1 + $0xc0] sm:$0xff]   ;;  %v3764_v54 = vld [vmem:[%s5156_s0 + $0xf4] ss:$20 sps:$4 sm:$0xff]   ;;  %v3819_v56 = vld [vmem:[%s5156_s0 + $0x43c] ss:$20 sps:$4 sm:$0xff]   ;;  %v1397_v57 = vsel %vm1395_vm0, %v3855_v50, 0 }
  0x13   :  { %1409 = vmatprep.subr.bf16.mxu0 %v3994_v0  ;;  %3587 = vmatprep.subr.bf16.mxu1 %v3994_v0  ;;  %v3817_v53 = vld [vmem:[%s5156_s0 + $0x410] ss:$20 sps:$4 sm:$0xff]   ;;  %v3812_v58 = vld [vmem:[%s5155_s1 + $0xd8] sm:$0xff]   ;;  %v3832_v1 = vld [vmem:[%s5155_s1 + $0xe8] sm:$0xff]  }
  0x14   :  { %v3805_v55 = vld [vmem:[%s5155_s1 + $0xd0] sm:$0xff]   ;;  %v3823_v60 = vld [vmem:[%s5156_s0 + $0x438] ss:$20 sps:$4 sm:$0xff]   ;;  %v3824_v62 = vld [vmem:[%s5155_s1 + $0xe0] sm:$0xff]  }
  0x15   :  { %v3766_v59 = vld [vmem:[%s5156_s0 + $0xf0] ss:$20 sps:$4 sm:$0xff]   ;;  %v3770_v2 = vld [vmem:[%s5156_s0 + $0x118] ss:$20 sps:$4 sm:$0xff]   ;;  %v3830_v3 = vld [vmem:[%s5156_s0 + $0x460] ss:$20 sps:$4 sm:$0xff]  }
  0x16   :  { %1410 = vmatpush1.bf16.msra.mxu0 %v3730_v7  ;;  %3603 = vmatpush1.bf16.msra.mxu1 %v3730_v7  ;;  %v3768_v61 = vld [vmem:[%s5156_s0 + $0x11c] ss:$20 sps:$4 sm:$0xff]   ;;  %v3826_v63 = vld [vmem:[%s5156_s0 + $0x464] ss:$20 sps:$4 sm:$0xff]   ;;  %v3833_v5 = vld [vmem:[%s5156_s0 + $0x48c] ss:$20 sps:$4 sm:$0xff]  }
  0x17   :  { %1411 = vmatprep.subr.bf16.mxu0 %v3994_v0  ;;  %3588 = vmatprep.subr.bf16.mxu1 %v3994_v0  ;;  %v3771_v4 = vld [vmem:[%s5156_s0 + $0x144] ss:$20 sps:$4 sm:$0xff]   ;;  %v3839_v6 = vld [vmem:[%s5155_s1 + $0xf0] sm:$0xff]  }
  0x18   :  { %v3852_v7 = vld [vmem:[%s5155_s1 + $0xf8] sm:$0xff]   ;;  %v3782_v13 = vld [vmem:[%s5156_s0 + $0x194] ss:$20 sps:$4 sm:$0xff]  }
  0x1a   :  { %1412 = vmatpush1.bf16.msra.mxu0 %v3731_v8  ;;  %3604 = vmatpush1.bf16.msra.mxu1 %v3731_v8  ;;  %v3773_v8 = vld [vmem:[%s5156_s0 + $0x140] ss:$20 sps:$4 sm:$0xff]  }
  0x1b   :  { %1413 = vmatprep.subr.bf16.mxu0 %v3994_v0  ;;  %3589 = vmatprep.subr.bf16.mxu1 %v3994_v0 }
  0x1e   :  { %1414 = vmatpush1.bf16.msra.mxu0 %v3732_v9  ;;  %3605 = vmatpush1.bf16.msra.mxu1 %v3732_v9  ;;  %v3837_v9 = vld [vmem:[%s5156_s0 + $0x488] ss:$20 sps:$4 sm:$0xff]  }
  0x1f   :  { %1415 = vmatprep.subr.bf16.mxu0 %v3994_v0  ;;  %3590 = vmatprep.subr.bf16.mxu1 %v3994_v0 }
  0x22   :  { %1416 = vmatpush1.bf16.msra.mxu0 %v3733_v10  ;;  %3606 = vmatpush1.bf16.msra.mxu1 %v3733_v10  ;;  %v3775_v10 = vld [vmem:[%s5156_s0 + $0x16c] ss:$20 sps:$4 sm:$0xff]  }
  0x23   :  { %1417 = vmatprep.subr.bf16.mxu0 %v3994_v0  ;;  %3591 = vmatprep.subr.bf16.mxu1 %v3994_v0 }
  0x26   :  { %1418 = vmatpush1.bf16.msra.mxu0 %v3734_v11  ;;  %3607 = vmatpush1.bf16.msra.mxu1 %v3734_v11  ;;  %v3840_v11 = vld [vmem:[%s5156_s0 + $0x4b4] ss:$20 sps:$4 sm:$0xff]  }
  0x27   :  { %1419 = vmatprep.subr.bf16.mxu0 %v3994_v0  ;;  %3592 = vmatprep.subr.bf16.mxu1 %v3994_v0 }
  0x2a   :  { %1420 = vmatpush1.bf16.msra.mxu0 %v3735_v12  ;;  %3608 = vmatpush1.bf16.msra.mxu1 %v3735_v12  ;;  %v3844_v12 = vld [vmem:[%s5156_s0 + $0x4b0] ss:$20 sps:$4 sm:$0xff]  }
  0x2b   :  { %1421 = vmatprep.subr.bf16.mxu0 %v3994_v0  ;;  %3593 = vmatprep.subr.bf16.mxu1 %v3994_v0 }
  0x2e   :  { %1422 = vmatpush1.bf16.msra.mxu0 %v3736_v14  ;;  %3609 = vmatpush1.bf16.msra.mxu1 %v3736_v14  ;;  %v3847_v14 = vld [vmem:[%s5156_s0 + $0x4dc] ss:$20 sps:$4 sm:$0xff]  }
  0x2f   :  { %1423 = vmatprep.subr.bf16.mxu0 %v3994_v0  ;;  %3594 = vmatprep.subr.bf16.mxu1 %v3994_v0 }
  0x32   :  { %1424 = vmatpush1.bf16.msra.mxu0 %v3737_v15  ;;  %3610 = vmatpush1.bf16.msra.mxu1 %v3737_v15  ;;  %v3784_v15 = vld [vmem:[%s5156_s0 + $0x190] ss:$20 sps:$4 sm:$0xff]  }
  0x33   :  { %1425 = vmatprep.subr.bf16.mxu0 %v3994_v0  ;;  %3595 = vmatprep.subr.bf16.mxu1 %v3994_v0 }
  0x36   :  { %1426 = vmatpush1.bf16.msra.mxu0 %v3738_v16  ;;  %3611 = vmatpush1.bf16.msra.mxu1 %v3738_v16  ;;  %v3851_v16 = vld [vmem:[%s5156_s0 + $0x4d8] ss:$20 sps:$4 sm:$0xff]  }
  0x37   :  { %1427 = vmatprep.subr.bf16.mxu0 %v3994_v0  ;;  %3596 = vmatprep.subr.bf16.mxu1 %v3994_v0 }
  0x3a   :  { %1428 = vmatpush1.bf16.msra.mxu0 %v3739_v17  ;;  %3612 = vmatpush1.bf16.msra.mxu1 %v3739_v17  ;;  %v3788_v17 = vld [vmem:[%s5156_s0 + $0x1bc] ss:$20 sps:$4 sm:$0xff]  }
  0x3b   :  { %1429 = vmatprep.subr.bf16.mxu0 %v3994_v0  ;;  %3597 = vmatprep.subr.bf16.mxu1 %v3994_v0 }
  0x3e   :  { %1430 = vmatpush1.bf16.msra.mxu0 %v3740_v18  ;;  %3613 = vmatpush1.bf16.msra.mxu1 %v3740_v18  ;;  %v3856_v18 = vld [vmem:[%s5156_s0 + $0x10] ss:$20 sps:$4 sm:$0xff]  }
  0x3f   :  { %1688 = vmatprep.subr.bf16.mxu0 %v3994_v0  ;;  %3424 = vmatprep.subr.bf16.mxu1 %v3846_v42 }
  0x41   :  { %1432 = vmatmul.mubr.bf16.vlgmr.msra.gmra.mrb[0].mxu0 %v3741_v19  ;;  %1600 = vmatmul.mubr.bf16.vlgmr.msra.gmra.mrb[0].mxu1 %v3779_v22  ;;  %v3791_v19 = vld [vmem:[%s5156_s0 + $0x1b8] ss:$20 sps:$4 sm:$0xff]   ;;  %v3864_v22 = vld [vmem:[%s5156_s0 + $0x60] ss:$20 sps:$4 sm:$0xff]  }
  0x42   :  { %1689 = vmatpush1.bf16.msra.mxu0 %v3744_v20  ;;  %1439 = vmatprep.mubr.bf16.mxu0 %v3745_v21  ;;  %v3860_v20 = vld [vmem:[%s5156_s0 + $0x38] ss:$20 sps:$4 sm:$0xff]  }
  0x43   :  { %1690 = vmatprep.subr.bf16.mxu0 %v3994_v0  ;;  %1607 = vmatprep.mubr.bf16.mxu1 %v3786_v23  ;;  %v3794_v21 = vld [vmem:[%s5156_s0 + $0x1e4] ss:$20 sps:$4 sm:$0xff]   ;;  %v3797_v23 = vld [vmem:[%s5156_s0 + $0x1e0] ss:$20 sps:$4 sm:$0xff]  }
  0x44   :  { %3425 = vmatpush3.bf16.msra.mxu1 %v3846_v42  ;;  %v3904_v42 = vld [vmem:[%s5156_s0 + $0x1f0] ss:$20 sps:$4 sm:$0xff]  }
  0x45   :  { %3426 = vmatprep.subr.bf16.mxu1 %v3853_v44 }
  0x46   :  { %1691 = vmatpush1.bf16.msra.mxu0 %v3748_v24  ;;  %v3867_v24 = vld [vmem:[%s5156_s0 + $0x88] ss:$20 sps:$4 sm:$0xff]  }
  0x47   :  { %1692 = vmatprep.subr.bf16.mxu0 %v3994_v0 }
  0x48   :  { %3427 = vmatpush3.bf16.msra.mxu1 %v3853_v44  ;;  %v3907_v44 = vld [vmem:[%s5156_s0 + $0x218] ss:$20 sps:$4 sm:$0xff]  }
  0x49   :  { %1440 = vmatmul.mubr.bf16.gmra.mrb[4].mxu0 %v3747_v25  ;;  %1608 = vmatmul.mubr.bf16.gmra.mrb[4].mxu1 %v3790_v26  ;;  %v3801_v25 = vld [vmem:[%s5156_s0 + $0x20c] ss:$20 sps:$4 sm:$0xff]   ;;  %v3872_v26 = vld [vmem:[%s5156_s0 + $0xb0] ss:$20 sps:$4 sm:$0xff]  }
  0x4a   :  { %1447 = vmatprep.mubr.bf16.mxu0 %v3749_v27  ;;  %1693 = vmatpush1.bf16.msra.mxu0 %v3752_v28  ;;  %v3804_v27 = vld [vmem:[%s5156_s0 + $0x208] ss:$20 sps:$4 sm:$0xff]   ;;  %v3875_v28 = vld [vmem:[%s5156_s0 + $0xd8] ss:$20 sps:$4 sm:$0xff]  }
  0x4b   :  { %1694 = vmatprep.subr.bf16.mxu0 %v3994_v0  ;;  %1615 = vmatprep.mubr.bf16.mxu1 %v3792_v29  ;;  %v3808_v29 = vld [vmem:[%s5156_s0 + $0x234] ss:$20 sps:$4 sm:$0xff]  }
  0x4c   :  { %3720 = vmatprep.subr.msk.bf16.mxu1 %vm1395_vm0, %v3855_v50  ;;  %v3845_v50 = vld [vmem:[%s5156_s0 + $0x2f8] ss:$20 sps:$4 sm:$0xff]  }
  0x4d   :  { %3429 = vmatpush3.bf16.msra.mxu1 %v1397_v57  ;;  %v3861_v57 = vld [vmem:[%s5156_s0 + $0x34] ss:$20 sps:$4 sm:$0xff]  }
  0x4e   :  { %1695 = vmatpush1.bf16.msra.mxu0 %v3759_v30  ;;  %v3880_v30 = vld [vmem:[%s5156_s0 + $0x100] ss:$20 sps:$4 sm:$0xff]  }
  0x4f   :  { %1696 = vmatprep.subr.bf16.mxu0 %v3994_v0 }
  0x51   :  { %1448 = vmatmul.mubr.bf16.gmra.mrb[8].mxu0 %v3751_v31  ;;  %1616 = vmatmul.mubr.bf16.gmra.mrb[8].mxu1 %v3796_v32  ;;  %v3811_v31 = vld [vmem:[%s5156_s0 + $0x230] ss:$20 sps:$4 sm:$0xff]   ;;  %v3883_v32 = vld [vmem:[%s5156_s0 + $0x128] ss:$20 sps:$4 sm:$0xff]  }
  0x52   :  { %1455 = vmatprep.mubr.bf16.mxu0 %v3753_v33  ;;  %1697 = vmatpush1.bf16.msra.mxu0 %v3763_v34  ;;  %v3815_v33 = vld [vmem:[%s5156_s0 + $0x25c] ss:$20 sps:$4 sm:$0xff]  }
  0x53   :  { %1698 = vmatprep.subr.bf16.mxu0 %v3994_v0  ;;  %1623 = vmatprep.mubr.bf16.mxu1 %v3799_v35  ;;  %v3888_v34 = vld [vmem:[%s5156_s0 + $0x150] ss:$20 sps:$4 sm:$0xff]   ;;  %v3818_v35 = vld [vmem:[%s5156_s0 + $0x258] ss:$20 sps:$4 sm:$0xff]  }
  0x56   :  { %1699 = vmatpush1.bf16.msra.mxu0 %v3767_v36  ;;  %v3891_v36 = vld [vmem:[%s5156_s0 + $0x178] ss:$20 sps:$4 sm:$0xff]  }
  0x57   :  { %1700 = vmatprep.subr.bf16.mxu0 %v3994_v0 }
  0x59   :  { %1456 = vmatmul.mubr.bf16.gmra.mrb[12].mxu0 %v3755_v37  ;;  %1624 = vmatmul.mubr.bf16.gmra.mrb[12].mxu1 %v3803_v38  ;;  %v3821_v37 = vld [vmem:[%s5156_s0 + $0x284] ss:$20 sps:$4 sm:$0xff]   ;;  %v3896_v38 = vld [vmem:[%s5156_s0 + $0x1a0] ss:$20 sps:$4 sm:$0xff]  }
  0x5a   :  { %1463 = vmatprep.mubr.bf16.mxu0 %v3756_v39  ;;  %1701 = vmatpush1.bf16.msra.mxu0 %v3774_v40  ;;  %v3825_v39 = vld [vmem:[%s5156_s0 + $0x280] ss:$20 sps:$4 sm:$0xff]   ;;  %v3899_v40 = vld [vmem:[%s5156_s0 + $0x1c8] ss:$20 sps:$4 sm:$0xff]  }
  0x5b   :  { %1702 = vmatprep.subr.bf16.mxu0 %v3994_v0  ;;  %1631 = vmatprep.mubr.bf16.mxu1 %v3806_v41  ;;  %v3828_v41 = vld [vmem:[%s5156_s0 + $0x2ac] ss:$20 sps:$4 sm:$0xff]  }
  0x5e   :  { %1703 = vmatpush1.bf16.msra.mxu0 %v3778_v43  ;;  %v3831_v43 = vld [vmem:[%s5156_s0 + $0x2a8] ss:$20 sps:$4 sm:$0xff]  }
  0x5f   :  { %1704 = vmatprep.subr.bf16.mxu0 %v3994_v0 }
  0x61   :  { %1464 = vmatmul.mubr.bf16.gmra.mrb[16].mxu0 %v3758_v45  ;;  %1632 = vmatmul.mubr.bf16.gmra.mrb[16].mxu1 %v3810_v46  ;;  %v3835_v45 = vld [vmem:[%s5156_s0 + $0x2d4] ss:$20 sps:$4 sm:$0xff]   ;;  %v3838_v46 = vld [vmem:[%s5156_s0 + $0x2d0] ss:$20 sps:$4 sm:$0xff]  }
  0x62   :  { %1471 = vmatprep.mubr.bf16.mxu0 %v3760_v47  ;;  %1705 = vmatpush1.bf16.msra.mxu0 %v3785_v48  ;;  %v3842_v47 = vld [vmem:[%s5156_s0 + $0x2fc] ss:$20 sps:$4 sm:$0xff]   ;;  %v3912_v48 = vld [vmem:[%s5156_s0 + $0x240] ss:$20 sps:$4 sm:$0xff]  }
  0x63   :  { %1706 = vmatprep.subr.bf16.mxu0 %v3994_v0  ;;  %1639 = vmatprep.mubr.bf16.mxu1 %v3813_v49  ;;  %v3915_v49 = vld [vmem:[%s5156_s0 + $0x268] ss:$20 sps:$4 sm:$0xff]  }
  0x66   :  { %1707 = vmatpush1.bf16.msra.mxu0 %v3798_v51  ;;  %v3849_v51 = vld [vmem:[%s5156_s0 + $0x324] ss:$20 sps:$4 sm:$0xff]  }
  0x67   :  { %1708 = vmatprep.subr.bf16.mxu0 %v3994_v0 }
  0x69   :  { %1472 = vmatmul.mubr.bf16.gmra.mrb[20].mxu0 %v3762_v52  ;;  %1640 = vmatmul.mubr.bf16.gmra.mrb[20].mxu1 %v3817_v53  ;;  %v3854_v52 = vld [vmem:[%s5156_s0 + $0x320] ss:$20 sps:$4 sm:$0xff]  }
  0x6a   :  { %1479 = vmatprep.mubr.bf16.mxu0 %v3764_v54  ;;  %1709 = vmatpush1.bf16.msra.mxu0 %v3805_v55  ;;  %v3859_v53 = vld [vmem:[%s5156_s0 + $0xc] ss:$20 sps:$4 sm:$0xff]   ;;  %v3920_v54 = vld [vmem:[%s5156_s0 + $0x290] ss:$20 sps:$4 sm:$0xff]  }
  0x6b   :  { %1710 = vmatprep.subr.bf16.mxu0 %v3994_v0  ;;  %1647 = vmatprep.mubr.bf16.mxu1 %v3819_v56  ;;  %v3923_v55 = vld [vmem:[%s5156_s0 + $0x2b8] ss:$20 sps:$4 sm:$0xff]   ;;  %v3857_v56 = vld [vmem:[%s5156_s0 + $0x8] ss:$20 sps:$4 sm:$0xff]  }
  0x6e   :  { %1711 = vmatpush1.bf16.msra.mxu0 %v3812_v58  ;;  %v3863_v58 = vld [vmem:[%s5156_s0 + $0x30] ss:$20 sps:$4 sm:$0xff]  }
  0x6f   :  { %1712 = vmatprep.subr.bf16.mxu0 %v3994_v0 }
  0x71   :  { %1480 = vmatmul.mubr.bf16.gmra.mrb[24].mxu0 %v3766_v59  ;;  %1648 = vmatmul.mubr.bf16.gmra.mrb[24].mxu1 %v3823_v60  ;;  %v3865_v59 = vld [vmem:[%s5156_s0 + $0x5c] ss:$20 sps:$4 sm:$0xff]   ;;  %v3928_v60 = vld [vmem:[%s5156_s0 + $0x2e0] ss:$20 sps:$4 sm:$0xff]  }
  0x72   :  { %1487 = vmatprep.mubr.bf16.mxu0 %v3768_v61  ;;  %1713 = vmatpush1.bf16.msra.mxu0 %v3824_v62  ;;  %v3931_v61 = vld [vmem:[%s5156_s0 + $0x308] ss:$20 sps:$4 sm:$0xff]   ;;  %v3868_v62 = vld [vmem:[%s5156_s0 + $0x58] ss:$20 sps:$4 sm:$0xff]  }
  0x73   :  { %1655 = vmatprep.mubr.bf16.mxu1 %v3826_v63  ;;  %1714 = vmatprep.subr.bf16.mxu0 %v3994_v0  ;;  %v3869_v63 = vld [vmem:[%s5156_s0 + $0x84] ss:$20 sps:$4 sm:$0xff]  }
  0x76   :  { %1715 = vmatpush1.bf16.msra.mxu0 %v3832_v1  ;;  %v3871_v1 = vld [vmem:[%s5156_s0 + $0x80] ss:$20 sps:$4 sm:$0xff]  }
  0x77   :  { %1716 = vmatprep.subr.bf16.mxu0 %v3994_v0 }
  0x79   :  { %1488 = vmatmul.mubr.bf16.gmra.mrb[28].mxu0 %v3770_v2  ;;  %1656 = vmatmul.mubr.bf16.gmra.mrb[28].mxu1 %v3830_v3  ;;  %v3873_v2 = vld [vmem:[%s5156_s0 + $0xac] ss:$20 sps:$4 sm:$0xff]   ;;  %v3936_v3 = vld [vmem:[%s5156_s0 + $0x330] ss:$20 sps:$4 sm:$0xff]  }
  0x7a   :  { %1495 = vmatprep.mubr.bf16.mxu0 %v3771_v4  ;;  %1663 = vmatprep.mubr.bf16.mxu1 %v3833_v5  ;;  %v3939_v4 = vld [vmem:[%s5156_s0 + $0x358] ss:$20 sps:$4 sm:$0xff]   ;;  %v3876_v5 = vld [vmem:[%s5156_s0 + $0xa8] ss:$20 sps:$4 sm:$0xff]  }
  0x7b   :  { %1717 = vmatpush1.bf16.msra.mxu0 %v3839_v6  ;;  %v3877_v6 = vld [vmem:[%s5156_s0 + $0xd4] ss:$20 sps:$4 sm:$0xff]  }
  0x7c   :  { %1718 = vmatprep.subr.bf16.mxu0 %v3994_v0  ;;  %v3777_v0 = vld [vmem:[%s5156_s0 + $0x168] ss:$20 sps:$4 sm:$0xff]  }
  0x7f   :  { %1719 = vmatpush1.bf16.msra.mxu0 %v3852_v7  ;;  %v3879_v7 = vld [vmem:[%s5156_s0 + $0xd0] ss:$20 sps:$4 sm:$0xff]  }
  0x81   :  { %1496 = vmatmul.mubr.bf16.gmra.mrb[32].mxu0 %v3773_v8  ;;  %1664 = vmatmul.mubr.bf16.gmra.mrb[32].mxu1 %v3837_v9  ;;  %v3881_v8 = vld [vmem:[%s5156_s0 + $0xfc] ss:$20 sps:$4 sm:$0xff]  }
  0x82   :  { %1503 = vmatprep.mubr.bf16.mxu0 %v3775_v10  ;;  %1671 = vmatprep.mubr.bf16.mxu1 %v3840_v11  ;;  %v3884_v10 = vld [vmem:[%s5156_s0 + $0xf8] ss:$20 sps:$4 sm:$0xff]  }
  0x89   :  { %1504 = vmatmul.mubr.bf16.gmra.mrb[36].mxu0 %v3777_v0  ;;  %1672 = vmatmul.mubr.bf16.gmra.mrb[36].mxu1 %v3844_v12  ;;  %v3885_v0 = vld [vmem:[%s5156_s0 + $0x124] ss:$20 sps:$4 sm:$0xff]  }
  0x8a   :  { %1511 = vmatprep.mubr.bf16.mxu0 %v3782_v13  ;;  %1679 = vmatprep.mubr.bf16.mxu1 %v3847_v14  ;;  %v3947_v14 = vld [vmem:[%s5156_s0 + $0x380] ss:$20 sps:$4 sm:$0xff]  }
  0x91   :  { %1512 = vmatmul.mubr.bf16.gmra.mrb[40].mxu0 %v3784_v15  ;;  %1680 = vmatmul.mubr.bf16.gmra.mrb[40].mxu1 %v3851_v16  ;;  %v3948_v15 = vld [vmem:[%s5156_s0 + $0x3a8] ss:$20 sps:$4 sm:$0xff]  }
  0x92   :  { %1519 = vmatprep.mubr.bf16.mxu0 %v3788_v17  ;;  %3430 = vmatprep.mubr.msk.bf16.mxu1 %vm1298_vm1, %v3856_v18  ;;  %v3887_v17 = vld [vmem:[%s5156_s0 + $0x120] ss:$20 sps:$4 sm:$0xff]  }
  0x99   :  { %1520 = vmatmul.mubr.bf16.gmra.mrb[44].mxu0 %v3791_v19  ;;  %3431 = vmatmul.mubr.msk.bf16.vlgmr.msra.gmra.mrb[44].mxu1 %vm1298_vm1, %v3860_v20  ;;  %v3889_v19 = vld [vmem:[%s5156_s0 + $0x14c] ss:$20 sps:$4 sm:$0xff]  }
  0x9a   :  { %1527 = vmatprep.mubr.bf16.mxu0 %v3794_v21  ;;  %3434 = vmatprep.mubr.msk.bf16.mxu1 %vm1298_vm1, %v3864_v22 }
  0xa1   :  { %1528 = vmatmul.mubr.bf16.gmra.mrb[48].mxu0 %v3797_v23  ;;  %3435 = vmatmul.mubr.msk.bf16.gmra.mrb[48].mxu1 %vm1298_vm1, %v3867_v24  ;;  %v3892_v23 = vld [vmem:[%s5156_s0 + $0x148] ss:$20 sps:$4 sm:$0xff]  }
  0xa2   :  { %1535 = vmatprep.mubr.bf16.mxu0 %v3801_v25  ;;  %3438 = vmatprep.mubr.msk.bf16.mxu1 %vm1298_vm1, %v3872_v26  ;;  %v3893_v25 = vld [vmem:[%s5156_s0 + $0x174] ss:$20 sps:$4 sm:$0xff]  }
  0xa9   :  { %1536 = vmatmul.mubr.bf16.gmra.mrb[52].mxu0 %v3804_v27  ;;  %3439 = vmatmul.mubr.msk.bf16.gmra.mrb[52].mxu1 %vm1298_vm1, %v3875_v28  ;;  %v3955_v28 = vld [vmem:[%s5156_s0 + $0x3d0] ss:$20 sps:$4 sm:$0xff]  }
  0xaa   :  { %1543 = vmatprep.mubr.bf16.mxu0 %v3808_v29  ;;  %3442 = vmatprep.mubr.msk.bf16.mxu1 %vm1298_vm1, %v3880_v30  ;;  %v3956_v29 = vld [vmem:[%s5156_s0 + $0x3f8] ss:$20 sps:$4 sm:$0xff]  }
  0xb1   :  { %1544 = vmatmul.mubr.bf16.gmra.mrb[56].mxu0 %v3811_v31  ;;  %3443 = vmatmul.mubr.msk.bf16.gmra.mrb[56].mxu1 %vm1298_vm1, %v3883_v32  ;;  %v3895_v31 = vld [vmem:[%s5156_s0 + $0x170] ss:$20 sps:$4 sm:$0xff]  }
  0xb2   :  { %1551 = vmatprep.mubr.bf16.mxu0 %v3815_v33  ;;  %3446 = vmatprep.mubr.msk.bf16.mxu1 %vm1298_vm1, %v3888_v34  ;;  %v3897_v33 = vld [vmem:[%s5156_s0 + $0x19c] ss:$20 sps:$4 sm:$0xff]  }
  0xb9   :  { %1552 = vmatmul.mubr.bf16.gmra.mrb[60].mxu0 %v3818_v35  ;;  %3447 = vmatmul.mubr.msk.bf16.gmra.mrb[60].mxu1 %vm1298_vm1, %v3891_v36  ;;  %v3960_v36 = vld [vmem:[%s5156_s0 + $0x420] ss:$20 sps:$4 sm:$0xff]  }
  0xba   :  { %1559 = vmatprep.mubr.bf16.mxu0 %v3821_v37  ;;  %3450 = vmatprep.mubr.msk.bf16.mxu1 %vm1298_vm1, %v3896_v38  ;;  %v3961_v37 = vld [vmem:[%s5156_s0 + $0x448] ss:$20 sps:$4 sm:$0xff]  }
  0xc1   :  { %1560 = vmatmul.mubr.bf16.gmra.mrb[64].mxu0 %v3825_v39  ;;  %3451 = vmatmul.mubr.msk.bf16.gmra.mrb[64].mxu1 %vm1298_vm1, %v3899_v40  ;;  %v3900_v39 = vld [vmem:[%s5156_s0 + $0x198] ss:$20 sps:$4 sm:$0xff]  }
  0xc2   :  { %1567 = vmatprep.mubr.bf16.mxu0 %v3828_v41  ;;  %3454 = vmatprep.mubr.msk.bf16.mxu1 %vm1298_vm1, %v3904_v42  ;;  %v3901_v41 = vld [vmem:[%s5156_s0 + $0x1c4] ss:$20 sps:$4 sm:$0xff]  }
  0xc9   :  { %1568 = vmatmul.mubr.bf16.gmra.mrb[68].mxu0 %v3831_v43  ;;  %3455 = vmatmul.mubr.msk.bf16.gmra.mrb[68].mxu1 %vm1298_vm1, %v3907_v44  ;;  %v3965_v44 = vld [vmem:[%s5156_s0 + $0x470] ss:$20 sps:$4 sm:$0xff]  }
  0xca   :  { %1575 = vmatprep.mubr.bf16.mxu0 %v3835_v45  ;;  %3458 = vmatprep.mubr.msk.bf16.mxu1 %vm1298_vm1, %v3912_v48  ;;  %v3966_v45 = vld [vmem:[%s5156_s0 + $0x498] ss:$20 sps:$4 sm:$0xff]  }
  0xd1   :  { %1576 = vmatmul.mubr.bf16.gmra.mrb[72].mxu0 %v3838_v46  ;;  %3459 = vmatmul.mubr.msk.bf16.gmra.mrb[72].mxu1 %vm1298_vm1, %v3915_v49  ;;  %v3905_v49 = vld [vmem:[%s5156_s0 + $0x1ec] ss:$20 sps:$4 sm:$0xff]  }
  0xd2   :  { %1583 = vmatprep.mubr.bf16.mxu0 %v3842_v47  ;;  %3462 = vmatprep.mubr.msk.bf16.mxu1 %vm1298_vm1, %v3920_v54  ;;  %v3903_v47 = vld [vmem:[%s5156_s0 + $0x1c0] ss:$20 sps:$4 sm:$0xff]  }
  0xd3   :  { %v3972_v54 = vld [vmem:[%s5157_s2] sm:$0xff]  }
  0xd4   :  { %3494 = vmatprep.subr.bf16.mxu1 %v3972_v54 }
  0xd5   :  { %3495 = vmatpush3.bf16.msra.mxu1 %v3972_v54 }
  0xd9   :  { %1584 = vmatmul.mubr.bf16.gmra.mrb[76].mxu0 %v3845_v50  ;;  %3463 = vmatmul.mubr.msk.bf16.gmra.mrb[76].mxu1 %vm1298_vm1, %v3923_v55 }
  0xda   :  { %1591 = vmatprep.mubr.bf16.mxu0 %v3849_v51  ;;  %3466 = vmatprep.mubr.msk.bf16.mxu1 %vm1298_vm1, %v3928_v60 }
  0xe1   :  { %1592 = vmatmul.mubr.bf16.gmra.mrb[80].mxu0 %v3854_v52  ;;  %3467 = vmatmul.mubr.msk.bf16.gmra.mrb[80].mxu1 %vm1298_vm1, %v3931_v61  ;;  %v3970_v52 = vld [vmem:[%s5156_s0 + $0x4c0] ss:$20 sps:$4 sm:$0xff]  }
  0xe2   :  { %1720 = vmatprep.mubr.bf16.mxu0 %v3859_v53  ;;  %3470 = vmatprep.mubr.msk.bf16.mxu1 %vm1298_vm1, %v3936_v3  ;;  %v3971_v53 = vld [vmem:[%s5156_s0 + $0x4e8] ss:$20 sps:$4 sm:$0xff]  }
  0xe9   :  { %1721 = vmatmul.mubr.bf16.vlgmr.msra.gmra.mrb[0].mxu0 %v3857_v56  ;;  %3471 = vmatmul.mubr.msk.bf16.gmra.mrb[84].mxu1 %vm1298_vm1, %v3939_v4  ;;  %v3908_v56 = vld [vmem:[%s5156_s0 + $0x1e8] ss:$20 sps:$4 sm:$0xff]  }
  0xea   :  { %1728 = vmatprep.mubr.bf16.mxu0 %v3861_v57  ;;  %3474 = vmatprep.mubr.msk.bf16.mxu1 %vm1298_vm1, %v3947_v14 }
  0xf1   :  { %1729 = vmatmul.mubr.bf16.gmra.mrb[4].mxu0 %v3863_v58  ;;  %3475 = vmatmul.mubr.msk.bf16.gmra.mrb[88].mxu1 %vm1298_vm1, %v3948_v15  ;;  %v3973_v58 = vld [vmem:[%s5157_s2 + $0x8] sm:$0xff]  }
  0xf2   :  { %1736 = vmatprep.mubr.bf16.mxu0 %v3865_v59  ;;  %3478 = vmatprep.mubr.msk.bf16.mxu1 %vm1298_vm1, %v3955_v28  ;;  %v3909_v59 = vld [vmem:[%s5156_s0 + $0x214] ss:$20 sps:$4 sm:$0xff]   ;;  %v3921_v15 = vld [vmem:[%s5156_s0 + $0x28c] ss:$20 sps:$4 sm:$0xff]  }
  0xf3   :  { %3496 = vmatprep.subr.bf16.mxu1 %v3973_v58 }
  0xf4   :  { %3497 = vmatpush3.bf16.msra.mxu1 %v3973_v58 }
  0xf9   :  { %1737 = vmatmul.mubr.bf16.gmra.mrb[8].mxu0 %v3868_v62  ;;  %3479 = vmatmul.mubr.msk.bf16.gmra.mrb[92].mxu1 %vm1298_vm1, %v3956_v29  ;;  %v3927_v29 = vld [vmem:[%s5156_s0 + $0x2b0] ss:$20 sps:$4 sm:$0xff]  }
  0xfa   :  { %1744 = vmatprep.mubr.bf16.mxu0 %v3869_v63  ;;  %3482 = vmatprep.mubr.msk.bf16.mxu1 %vm1298_vm1, %v3960_v36  ;;  %v3911_v63 = vld [vmem:[%s5156_s0 + $0x210] ss:$20 sps:$4 sm:$0xff]  }
 0x101   :  { %1745 = vmatmul.mubr.bf16.gmra.mrb[12].mxu0 %v3871_v1  ;;  %3483 = vmatmul.mubr.msk.bf16.gmra.mrb[96].mxu1 %vm1298_vm1, %v3961_v37  ;;  %v3932_v37 = vld [vmem:[%s5156_s0 + $0x2d8] ss:$20 sps:$4 sm:$0xff]  }
 0x102   :  { %1752 = vmatprep.mubr.bf16.mxu0 %v3873_v2  ;;  %3486 = vmatprep.mubr.msk.bf16.mxu1 %vm1298_vm1, %v3965_v44  ;;  %v3913_v2 = vld [vmem:[%s5156_s0 + $0x23c] ss:$20 sps:$4 sm:$0xff]  }
 0x109   :  { %1753 = vmatmul.mubr.bf16.gmra.mrb[16].mxu0 %v3876_v5  ;;  %3487 = vmatmul.mubr.msk.bf16.gmra.mrb[100].mxu1 %vm1298_vm1, %v3966_v45  ;;  %v3935_v45 = vld [vmem:[%s5156_s0 + $0x300] ss:$20 sps:$4 sm:$0xff]  }
 0x10a   :  { %1760 = vmatprep.mubr.bf16.mxu0 %v3877_v6  ;;  %3490 = vmatprep.mubr.msk.bf16.mxu1 %vm1298_vm1, %v3970_v52  ;;  %v3916_v6 = vld [vmem:[%s5156_s0 + $0x238] ss:$20 sps:$4 sm:$0xff]  }
 0x111   :  { %1761 = vmatmul.mubr.bf16.gmra.mrb[20].mxu0 %v3879_v7  ;;  %3491 = vmatmul.mubr.msk.bf16.gmra.mrb[104].mxu1 %vm1298_vm1, %v3971_v53  ;;  %v3940_v53 = vld [vmem:[%s5156_s0 + $0x328] ss:$20 sps:$4 sm:$0xff]  }
 0x112   :  { %1768 = vmatprep.mubr.bf16.mxu0 %v3881_v8  ;;  %v3917_v8 = vld [vmem:[%s5156_s0 + $0x264] ss:$20 sps:$4 sm:$0xff]  }
 0x114   :  { %v4510_v9 = vpop.f32.mrb[0].mxu1 }
 0x115   :  { %v1603_v11 = vpop.f32.mrb[1].mxu1 }
 0x116   :  { %v4518_v12 = vpop.f32.mrb[2].mxu1 }
 0x117   :  { %v1606_v13 = vpop.f32.mrb[3].mxu1 }
 0x118   :  { %v3919_v13 = vld [vmem:[%s5156_s0 + $0x260] ss:$20 sps:$4 sm:$0xff]  }
 0x119   :  { %1769 = vmatmul.mubr.bf16.gmra.mrb[24].mxu0 %v3884_v10 }
 0x11a   :  { %1776 = vmatprep.mubr.bf16.mxu0 %v3885_v0 }
 0x11c   :  { %v4528_v16 = vpop.f32.mrb[4].mxu1 }
 0x11d   :  { %v1611_v18 = vpop.f32.mrb[5].mxu1 }
 0x11e   :  { %v4536_v20 = vpop.f32.mrb[6].mxu1 }
 0x11f   :  { %v1614_v21 = vpop.f32.mrb[7].mxu1 }
 0x120   :  { %v3924_v21 = vld [vmem:[%s5156_s0 + $0x288] ss:$20 sps:$4 sm:$0xff]  }
 0x121   :  { %1777 = vmatmul.mubr.bf16.gmra.mrb[28].mxu0 %v3887_v17 }
 0x122   :  { %1784 = vmatprep.mubr.bf16.mxu0 %v3889_v19 }
 0x124   :  { %v4538_v22 = vpop.f32.mrb[8].mxu1 }
 0x125   :  { %v1619_v24 = vpop.f32.mrb[9].mxu1 }
 0x126   :  { %v4546_v26 = vpop.f32.mrb[10].mxu1  ;;  %v3925_v24 = vld [vmem:[%s5156_s0 + $0x2b4] ss:$20 sps:$4 sm:$0xff]  }
 0x127   :  { %v1622_v27 = vpop.f32.mrb[11].mxu1 }
 0x129   :  { %1785 = vmatmul.mubr.bf16.gmra.mrb[32].mxu0 %v3892_v23 }
 0x12a   :  { %1792 = vmatprep.mubr.bf16.mxu0 %v3893_v25 }
 0x12c   :  { %v4556_v30 = vpop.f32.mrb[12].mxu1 }
 0x12d   :  { %v1627_v32 = vpop.f32.mrb[13].mxu1 }
 0x12e   :  { %v4564_v34 = vpop.f32.mrb[14].mxu1  ;;  %v3929_v32 = vld [vmem:[%s5156_s0 + $0x2dc] ss:$20 sps:$4 sm:$0xff]  }
 0x12f   :  { %v1630_v35 = vpop.f32.mrb[15].mxu1 }
 0x131   :  { %1793 = vmatmul.mubr.bf16.gmra.mrb[36].mxu0 %v3895_v31 }
 0x132   :  { %1800 = vmatprep.mubr.bf16.mxu0 %v3897_v33 }
 0x134   :  { %v4574_v38 = vpop.f32.mrb[16].mxu1 }
 0x135   :  { %v1635_v40 = vpop.f32.mrb[17].mxu1 }
 0x136   :  { %v4582_v42 = vpop.f32.mrb[18].mxu1  ;;  %v3933_v40 = vld [vmem:[%s5156_s0 + $0x304] ss:$20 sps:$4 sm:$0xff]  }
 0x137   :  { %v1638_v43 = vpop.f32.mrb[19].mxu1 }
 0x139   :  { %1801 = vmatmul.mubr.bf16.gmra.mrb[40].mxu0 %v3900_v39 }
 0x13a   :  { %1808 = vmatprep.mubr.bf16.mxu0 %v3901_v41 }
 0x13c   :  { %v4592_v46 = vpop.f32.mrb[20].mxu1 }
 0x13d   :  { %v1643_v48 = vpop.f32.mrb[21].mxu1 }
 0x13e   :  { %v4600_v50 = vpop.f32.mrb[22].mxu1  ;;  %v3937_v48 = vld [vmem:[%s5156_s0 + $0x32c] ss:$20 sps:$4 sm:$0xff]  }
 0x13f   :  { %v1646_v51 = vpop.f32.mrb[23].mxu1 }
 0x141   :  { %1809 = vmatmul.mubr.bf16.gmra.mrb[44].mxu0 %v3903_v47 }
 0x142   :  { %1816 = vmatprep.mubr.bf16.mxu0 %v3905_v49 }
 0x144   :  { %v4613_v55 = vpop.f32.mrb[24].mxu1 }
 0x145   :  { %v1651_v57 = vpop.f32.mrb[25].mxu1 }
 0x146   :  { %v4624_v60 = vpop.f32.mrb[26].mxu1 }
 0x147   :  { %v1654_v61 = vpop.f32.mrb[27].mxu1 }
 0x148   :  { %v3943_v61 = vld [vmem:[%s5156_s0 + $0x350] ss:$20 sps:$4 sm:$0xff]  }
 0x149   :  { %1817 = vmatmul.mubr.bf16.gmra.mrb[48].mxu0 %v3908_v56  ;;  %v3941_v56 = vld [vmem:[%s5156_s0 + $0x354] ss:$20 sps:$4 sm:$0xff]  }
 0x14a   :  { %1824 = vmatprep.mubr.bf16.mxu0 %v3909_v59 }
 0x14c   :  { %v4626_v62 = vpop.f32.mrb[28].mxu1 }
 0x14d   :  { %5163 = vst [vmem:[#allocation2_spill] sm:$0xff] %v4626_v62  ;;  %v1659_v1 = vpop.f32.mrb[29].mxu1 }
 0x14e   :  { %v4634_v3 = vpop.f32.mrb[30].mxu1  ;;  %v3944_v1 = vld [vmem:[%s5156_s0 + $0x37c] ss:$20 sps:$4 sm:$0xff]  }
 0x14f   :  { %5164 = vst [vmem:[#allocation3_spill] sm:$0xff] %v4634_v3  ;;  %v1662_v4 = vpop.f32.mrb[31].mxu1 }
 0x151   :  { %1825 = vmatmul.mubr.bf16.gmra.mrb[52].mxu0 %v3911_v63 }
 0x152   :  { %1832 = vmatprep.mubr.bf16.mxu0 %v3913_v2 }
 0x154   :  { %v4636_v5 = vpop.f32.mrb[32].mxu1 }
 0x155   :  { %5165 = vst [vmem:[#allocation4_spill] sm:$0xff] %v4636_v5  ;;  %v1667_v7 = vpop.f32.mrb[33].mxu1  ;;  %v3983_v5 = vld [vmem:[%s5156_s0 + $0x4e4] ss:$20 sps:$4 sm:$0xff]  }
 0x156   :  { %v4644_v10 = vpop.f32.mrb[34].mxu1  ;;  %v3946_v7 = vld [vmem:[%s5156_s0 + $0x378] ss:$20 sps:$4 sm:$0xff]  }
 0x157   :  { %5166 = vst [vmem:[#allocation5_spill] sm:$0xff] %v4644_v10  ;;  %v1670_v11 = vpop.f32.mrb[35].mxu1 }
 0x158   :  { %v3949_v11 = vld [vmem:[%s5156_s0 + $0x3a4] ss:$20 sps:$4 sm:$0xff]  }
 0x159   :  { %1833 = vmatmul.mubr.bf16.gmra.mrb[56].mxu0 %v3916_v6 }
 0x15a   :  { %1840 = vmatprep.mubr.bf16.mxu0 %v3917_v8 }
 0x15c   :  { %v4646_v0 = vpop.f32.mrb[36].mxu1 }
 0x15d   :  { %5167 = vst [vmem:[#allocation6_spill] sm:$0xff] %v4646_v0  ;;  %v1675_v14 = vpop.f32.mrb[37].mxu1  ;;  %v3976_v0 = vld [vmem:[%s5156_s0 + $0x468] ss:$20 sps:$4 sm:$0xff]  }
 0x15e   :  { %v4654_v17 = vpop.f32.mrb[38].mxu1 }
 0x15f   :  { %5168 = vst [vmem:[#allocation7_spill] sm:$0xff] %v4654_v17  ;;  %v1678_v18 = vpop.f32.mrb[39].mxu1 }
 0x160   :  { %v3951_v18 = vld [vmem:[%s5156_s0 + $0x3a0] ss:$20 sps:$4 sm:$0xff]  }
 0x161   :  { %1841 = vmatmul.mubr.bf16.gmra.mrb[60].mxu0 %v3919_v13 }
 0x162   :  { %1848 = vmatprep.mubr.bf16.mxu0 %v3921_v15 }
 0x164   :  { %v4656_v19 = vpop.f32.mrb[40].mxu1 }
 0x165   :  { %5169 = vst [vmem:[#allocation8_spill] sm:$0xff] %v4656_v19  ;;  %v1683_v23 = vpop.f32.mrb[41].mxu1 }
 0x166   :  { %v4664_v25 = vpop.f32.mrb[42].mxu1  ;;  %v3952_v23 = vld [vmem:[%s5156_s0 + $0x3cc] ss:$20 sps:$4 sm:$0xff]  }
 0x167   :  { %5170 = vst [vmem:[#allocation9_spill] sm:$0xff] %v4664_v25  ;;  %v1686_v27 = vpop.f32.mrb[43].mxu1 }
 0x169   :  { %1849 = vmatmul.mubr.bf16.gmra.mrb[64].mxu0 %v3924_v21 }
 0x16a   :  { %1856 = vmatprep.mubr.bf16.mxu0 %v3925_v24 }
 0x16c   :  { %v4666_v28 = vpop.f32.mrb[44].mxu1 }
 0x16d   :  { %v4671_v31 = vpop.f32.mrb[45].mxu1 }
 0x16e   :  { %v4676_v33 = vpop.f32.mrb[46].mxu1 }
 0x16f   :  { %v4678_v35 = vpop.f32.mrb[47].mxu1 }
 0x171   :  { %1857 = vmatmul.mubr.bf16.gmra.mrb[68].mxu0 %v3927_v29  ;;  %v3954_v29 = vld [vmem:[%s5156_s0 + $0x3c8] ss:$20 sps:$4 sm:$0xff]  }
 0x172   :  { %1864 = vmatprep.mubr.bf16.mxu0 %v3929_v32  ;;  %v3957_v32 = vld [vmem:[%s5156_s0 + $0x3f4] ss:$20 sps:$4 sm:$0xff]  }
 0x174   :  { %v4680_v36 = vpop.f32.mrb[48].mxu1 }
 0x175   :  { %v4685_v39 = vpop.f32.mrb[49].mxu1 }
 0x176   :  { %v4690_v41 = vpop.f32.mrb[50].mxu1 }
 0x177   :  { %v4692_v43 = vpop.f32.mrb[51].mxu1 }
 0x179   :  { %1865 = vmatmul.mubr.bf16.gmra.mrb[72].mxu0 %v3932_v37 }
 0x17a   :  { %1872 = vmatprep.mubr.bf16.mxu0 %v3933_v40 }
 0x17c   :  { %v4694_v44 = vpop.f32.mrb[52].mxu1 }
 0x17d   :  { %v4699_v47 = vpop.f32.mrb[53].mxu1 }
 0x17e   :  { %v4704_v49 = vpop.f32.mrb[54].mxu1 }
 0x17f   :  { %v4706_v51 = vpop.f32.mrb[55].mxu1 }
 0x181   :  { %1873 = vmatmul.mubr.bf16.gmra.mrb[76].mxu0 %v3935_v45  ;;  %v3959_v45 = vld [vmem:[%s5156_s0 + $0x3f0] ss:$20 sps:$4 sm:$0xff]  }
 0x182   :  { %1880 = vmatprep.mubr.bf16.mxu0 %v3937_v48 }
 0x184   :  { %v4708_v52 = vpop.f32.mrb[56].mxu1 }
 0x185   :  { %v4713_v54 = vpop.f32.mrb[57].mxu1 }
 0x186   :  { %v4718_v57 = vpop.f32.mrb[58].mxu1 }
 0x187   :  { %v4720_v58 = vpop.f32.mrb[59].mxu1 }
 0x189   :  { %1881 = vmatmul.mubr.bf16.gmra.mrb[80].mxu0 %v3940_v53  ;;  %v3962_v53 = vld [vmem:[%s5156_s0 + $0x41c] ss:$20 sps:$4 sm:$0xff]  }
 0x18a   :  { %1888 = vmatprep.mubr.bf16.mxu0 %v3941_v56 }
 0x18c   :  { %v4722_v59 = vpop.f32.mrb[60].mxu1 }
 0x18d   :  { %v4727_v63 = vpop.f32.mrb[61].mxu1 }
 0x18e   :  { %v4732_v2 = vpop.f32.mrb[62].mxu1 }
 0x18f   :  { %v4734_v4 = vpop.f32.mrb[63].mxu1 }
 0x191   :  { %1889 = vmatmul.mubr.bf16.gmra.mrb[84].mxu0 %v3943_v61  ;;  %v3964_v61 = vld [vmem:[%s5156_s0 + $0x418] ss:$20 sps:$4 sm:$0xff]  }
 0x192   :  { %1896 = vmatprep.mubr.bf16.mxu0 %v3944_v1  ;;  %v3967_v1 = vld [vmem:[%s5156_s0 + $0x444] ss:$20 sps:$4 sm:$0xff]  }
 0x194   :  { %v4736_v6 = vpop.f32.mrb[64].mxu1 }
 0x195   :  { %v4741_v8 = vpop.f32.mrb[65].mxu1 }
 0x196   :  { %v4746_v13 = vpop.f32.mrb[66].mxu1 }
 0x197   :  { %v4748_v14 = vpop.f32.mrb[67].mxu1 }
 0x199   :  { %1897 = vmatmul.mubr.bf16.gmra.mrb[88].mxu0 %v3946_v7 }
 0x19a   :  { %1904 = vmatprep.mubr.bf16.mxu0 %v3949_v11 }
 0x19c   :  { %v4750_v15 = vpop.f32.mrb[68].mxu1 }
 0x19d   :  { %v4755_v21 = vpop.f32.mrb[69].mxu1 }
 0x19e   :  { %v4760_v24 = vpop.f32.mrb[70].mxu1 }
 0x19f   :  { %v4762_v27 = vpop.f32.mrb[71].mxu1 }
 0x1a1   :  { %1905 = vmatmul.mubr.bf16.gmra.mrb[92].mxu0 %v3951_v18 }
 0x1a2   :  { %1912 = vmatprep.mubr.bf16.mxu0 %v3952_v23 }
 0x1a4   :  { %v4770_v37 = vpop.f32.mrb[72].mxu1 }
 0x1a5   :  { %v4772_v40 = vpop.f32.mrb[73].mxu1 }
 0x1a6   :  { %v4777_v48 = vpop.f32.mrb[74].mxu1 }
 0x1a7   :  { %v4782_v56 = vpop.f32.mrb[75].mxu1 }
 0x1a9   :  { %1913 = vmatmul.mubr.bf16.gmra.mrb[96].mxu0 %v3954_v29 }
 0x1aa   :  { %1920 = vmatprep.mubr.bf16.mxu0 %v3957_v32  ;;  %v3969_v32 = vld [vmem:[%s5156_s0 + $0x440] ss:$20 sps:$4 sm:$0xff]  }
 0x1ac   :  { %v4790_v7 = vpop.f32.mrb[76].mxu1 }
 0x1ad   :  { %v4792_v18 = vpop.f32.mrb[77].mxu1 }
 0x1b1   :  { %1921 = vmatmul.mubr.bf16.gmra.mrb[100].mxu0 %v3959_v45  ;;  %v4798_v45 = vpop.f32.mrb[78].mxu1 }
 0x1b2   :  { %1928 = vmatprep.mubr.bf16.mxu0 %v3962_v53  ;;  %v4803_v25 = vpop.f32.mrb[79].mxu1 }
 0x1b9   :  { %1929 = vmatmul.mubr.bf16.gmra.mrb[104].mxu0 %v3964_v61  ;;  %v3974_v61 = vld [vmem:[%s5156_s0 + $0x46c] ss:$20 sps:$4 sm:$0xff]  }
 0x1ba   :  { %1936 = vmatprep.mubr.bf16.mxu0 %v3967_v1 }
 0x1bc   :  { %v1722_v11 = vpop.f32.mrb[0].mxu0 }
 0x1bd   :  { %v2012_v23 = vadd.f32 %v4671_v31, %v1722_v11  ;;  %v1724_v29 = vpop.f32.mrb[1].mxu0 }
 0x1be   :  { %v1725_v53 = vpop.f32.mrb[2].mxu0 }
 0x1bf   :  { %v2015_v1 = vadd.f32 %v4678_v35, %v1725_v53  ;;  %v1727_v19 = vpop.f32.mrb[3].mxu0  ;;  %v3977_v35 = vld [vmem:[%s5156_s0 + $0x494] ss:$20 sps:$4 sm:$0xff]   ;;  %v4815_v53 = vpop.f32.mrb[80].mxu1 }
 0x1c1   :  { %v2266_v17 = vpack.c.bf16 %v2015_v1, %v2012_v23  ;;  %1937 = vmatmul.mubr.bf16.gmra.mrb[108].mxu0 %v3969_v32 }
 0x1c2   :  { %1944 = vmatprep.mubr.bf16.mxu0 %v3974_v61 }
 0x1c3   :  { %3498 = vmatprep.mubr.msk.bf16.mxu1 %vm2321_vm2, %v2266_v17 }
 0x1c4   :  { %v1730_v31 = vpop.f32.mrb[4].mxu0 }
 0x1c5   :  { %v2020_v11 = vadd.f32 %v4666_v28, %v1730_v31  ;;  %v1732_v29 = vpop.f32.mrb[5].mxu0  ;;  %v4818_v28 = vpop.f32.mrb[81].mxu1  ;;  %v3979_v31 = vld [vmem:[%s5156_s0 + $0x490] ss:$20 sps:$4 sm:$0xff]  }
 0x1c6   :  { %v1733_v10 = vpop.f32.mrb[6].mxu0  ;;  %v4824_v29 = vpop.f32.mrb[82].mxu1 }
 0x1c7   :  { %v2023_v19 = vadd.f32 %v4676_v33, %v1733_v10  ;;  %v1735_v23 = vpop.f32.mrb[7].mxu0  ;;  %v4829_v33 = vpop.f32.mrb[83].mxu1 }
 0x1c9   :  { %v2267_v32 = vpack.c.bf16 %v2023_v19, %v2020_v11  ;;  %1945 = vmatmul.mubr.bf16.gmra.mrb[112].mxu0 %v3976_v0  ;;  %v3980_v0 = vld [vmem:[%s5156_s0 + $0x4bc] ss:$20 sps:$4 sm:$0xff]  }
 0x1ca   :  { %1952 = vmatprep.mubr.bf16.mxu0 %v3977_v35 }
 0x1cb   :  { %3499 = vmatmul.mubr.msk.bf16.vlgmr.msra.gmra.mrb[108].mxu1 %vm2321_vm2, %v2267_v32 }
 0x1cc   :  { %v1738_v17 = vpop.f32.mrb[8].mxu0 }
 0x1cd   :  { %v2028_v61 = vadd.f32 %v4685_v39, %v1738_v17  ;;  %v1740_v1 = vpop.f32.mrb[9].mxu0  ;;  %v3982_v17 = vld [vmem:[%s5156_s0 + $0x4b8] ss:$20 sps:$4 sm:$0xff]  }
 0x1ce   :  { %v1741_v10 = vpop.f32.mrb[10].mxu0 }
 0x1cf   :  { %v2031_v11 = vadd.f32 %v4692_v43, %v1741_v10  ;;  %v1743_v35 = vpop.f32.mrb[11].mxu0  ;;  %v4841_v10 = vpop.f32.mrb[84].mxu1 }
 0x1d1   :  { %v2268_v19 = vpack.c.bf16 %v2031_v11, %v2028_v61  ;;  %1953 = vmatmul.mubr.bf16.gmra.mrb[116].mxu0 %v3979_v31 }
 0x1d2   :  { %1960 = vmatprep.mubr.bf16.mxu0 %v3980_v0  ;;  %v4844_v0 = vpop.f32.mrb[85].mxu1 }
 0x1d3   :  { %3502 = vmatprep.mubr.msk.bf16.mxu1 %vm2321_vm2, %v2268_v19  ;;  %v3985_v19 = vld [vmem:[%s5156_s0 + $0x4e0] ss:$20 sps:$4 sm:$0xff]  }
 0x1d4   :  { %v1746_v39 = vpop.f32.mrb[12].mxu0 }
 0x1d5   :  { %v2036_v23 = vadd.f32 %v4680_v36, %v1746_v39  ;;  %v1748_v32 = vpop.f32.mrb[13].mxu0  ;;  %v4850_v39 = vpop.f32.mrb[86].mxu1 }
 0x1d6   :  { %v1749_v1 = vpop.f32.mrb[14].mxu0 }
 0x1d7   :  { %v2039_v43 = vadd.f32 %v4690_v41, %v1749_v1  ;;  %v1751_v61 = vpop.f32.mrb[15].mxu0 }
 0x1d9   :  { %v2269_v31 = vpack.c.bf16 %v2039_v43, %v2036_v23  ;;  %1961 = vmatmul.mubr.bf16.gmra.mrb[120].mxu0 %v3982_v17  ;;  %v4852_v23 = vpop.f32.mrb[87].mxu1 }
 0x1da   :  { %1968 = vmatprep.mubr.bf16.mxu0 %v3983_v5 }
 0x1db   :  { %3503 = vmatmul.mubr.msk.bf16.gmra.mrb[112].mxu1 %vm2321_vm2, %v2269_v31 }
 0x1dc   :  { %v1754_v36 = vpop.f32.mrb[16].mxu0 }
 0x1dd   :  { %v2044_v11 = vadd.f32 %v4699_v47, %v1754_v36  ;;  %v1756_v35 = vpop.f32.mrb[17].mxu0 }
 0x1de   :  { %v1757_v41 = vpop.f32.mrb[18].mxu0 }
 0x1df   :  { %v2047_v32 = vadd.f32 %v4706_v51, %v1757_v41  ;;  %v1759_v5 = vpop.f32.mrb[19].mxu0  ;;  %v4860_v41 = vpop.f32.mrb[88].mxu1 }
 0x1e1   :  { %v2270_v17 = vpack.c.bf16 %v2047_v32, %v2044_v11  ;;  %1969 = vmatmul.mubr.bf16.gmra.mrb[124].mxu0 %v3985_v19  ;;  %v4862_v19 = vpop.f32.mrb[89].mxu1 }
 0x1e2   :  { %v4865_v5 = vpop.f32.mrb[90].mxu1 }
 0x1e3   :  { %3506 = vmatprep.mubr.msk.bf16.mxu1 %vm2321_vm2, %v2270_v17  ;;  %v4867_v17 = vpop.f32.mrb[91].mxu1 }
 0x1e4   :  { %v1762_v1 = vpop.f32.mrb[20].mxu0 }
 0x1e5   :  { %v2052_v47 = vadd.f32 %v4694_v44, %v1762_v1  ;;  %v1764_v43 = vpop.f32.mrb[21].mxu0 }
 0x1e6   :  { %v1765_v61 = vpop.f32.mrb[22].mxu0 }
 0x1e7   :  { %v2055_v31 = vadd.f32 %v4704_v49, %v1765_v61  ;;  %v1767_v36 = vpop.f32.mrb[23].mxu0 }
 0x1e9   :  { %v2271_v35 = vpack.c.bf16 %v2055_v31, %v2052_v47 }
 0x1eb   :  { %3507 = vmatmul.mubr.msk.bf16.gmra.mrb[116].mxu1 %vm2321_vm2, %v2271_v35 }
 0x1ec   :  { %v1770_v3 = vpop.f32.mrb[24].mxu0 }
 0x1ed   :  { %v2060_v62 = vadd.f32 %v4713_v54, %v1770_v3  ;;  %v1772_v51 = vpop.f32.mrb[25].mxu0 }
 0x1ee   :  { %v1773_v11 = vpop.f32.mrb[26].mxu0  ;;  %v4874_v51 = vpop.f32.mrb[92].mxu1 }
 0x1ef   :  { %v2063_v32 = vadd.f32 %v4720_v58, %v1773_v11  ;;  %v1775_v44 = vpop.f32.mrb[27].mxu0  ;;  %v4876_v11 = vpop.f32.mrb[93].mxu1 }
 0x1f0   :  { %v4879_v44 = vpop.f32.mrb[94].mxu1 }
 0x1f1   :  { %v2272_v49 = vpack.c.bf16 %v2063_v32, %v2060_v62 }
 0x1f3   :  { %3510 = vmatprep.mubr.msk.bf16.mxu1 %vm2321_vm2, %v2272_v49  ;;  %v4881_v49 = vpop.f32.mrb[95].mxu1 }
 0x1f4   :  { %v1778_v1 = vpop.f32.mrb[28].mxu0 }
 0x1f5   :  { %v2068_v47 = vadd.f32 %v4708_v52, %v1778_v1  ;;  %v1780_v3 = vpop.f32.mrb[29].mxu0 }
 0x1f6   :  { %v1781_v54 = vpop.f32.mrb[30].mxu0 }
 0x1f7   :  { %v2071_v43 = vadd.f32 %v4718_v57, %v1781_v54  ;;  %v1783_v61 = vpop.f32.mrb[31].mxu0 }
 0x1f9   :  { %v2273_v31 = vpack.c.bf16 %v2071_v43, %v2068_v47 }
 0x1fb   :  { %3511 = vmatmul.mubr.msk.bf16.gmra.mrb[120].mxu1 %vm2321_vm2, %v2273_v31 }
 0x1fc   :  { %v1786_v58 = vpop.f32.mrb[32].mxu0 }
 0x1fd   :  { %v2076_v36 = vadd.f32 %v4727_v63, %v1786_v58  ;;  %v1788_v35 = vpop.f32.mrb[33].mxu0 }
 0x1fe   :  { %v1789_v62 = vpop.f32.mrb[34].mxu0  ;;  %v4888_v35 = vpop.f32.mrb[96].mxu1 }
 0x1ff   :  { %v2079_v32 = vadd.f32 %v4734_v4, %v1789_v62  ;;  %v1791_v52 = vpop.f32.mrb[35].mxu0  ;;  %v4890_v62 = vpop.f32.mrb[97].mxu1 }
 0x200   :  { %v4893_v52 = vpop.f32.mrb[98].mxu1 }
 0x201   :  { %v2274_v57 = vpack.c.bf16 %v2079_v32, %v2076_v36 }
 0x203   :  { %3514 = vmatprep.mubr.msk.bf16.mxu1 %vm2321_vm2, %v2274_v57  ;;  %v4895_v57 = vpop.f32.mrb[99].mxu1 }
 0x204   :  { %v1794_v1 = vpop.f32.mrb[36].mxu0 }
 0x205   :  { %v2084_v47 = vadd.f32 %v4722_v59, %v1794_v1  ;;  %v1796_v63 = vpop.f32.mrb[37].mxu0 }
 0x206   :  { %v1797_v3 = vpop.f32.mrb[38].mxu0 }
 0x207   :  { %v2087_v54 = vadd.f32 %v4732_v2, %v1797_v3  ;;  %v1799_v43 = vpop.f32.mrb[39].mxu0  ;;  %v4899_v3 = vpop.f32.mrb[100].mxu1 }
 0x209   :  { %v2275_v61 = vpack.c.bf16 %v2087_v54, %v2084_v47 }
 0x20b   :  { %3515 = vmatmul.mubr.msk.bf16.gmra.mrb[124].mxu1 %vm2321_vm2, %v2275_v61  ;;  %v4902_v61 = vpop.f32.mrb[101].mxu1 }
 0x20c   :  { %v1802_v4 = vpop.f32.mrb[40].mxu0 }
 0x20d   :  { %v2092_v31 = vadd.f32 %v4741_v8, %v1802_v4  ;;  %v1804_v58 = vpop.f32.mrb[41].mxu0 }
 0x20e   :  { %v1805_v36 = vpop.f32.mrb[42].mxu0 }
 0x20f   :  { %v2095_v32 = vadd.f32 %v4748_v14, %v1805_v36  ;;  %v1807_v59 = vpop.f32.mrb[43].mxu0  ;;  %v4904_v14 = vpop.f32.mrb[102].mxu1 }
 0x210   :  { %5171 = vst [vmem:[#allocation10_spill] sm:$0xff] %v4904_v14  ;;  %v4906_v58 = vpop.f32.mrb[103].mxu1 }
 0x211   :  { %v2276_v2 = vpack.c.bf16 %v2095_v32, %v2092_v31  ;;  %v4908_v31 = vpop.f32.mrb[104].mxu1 }
 0x212   :  { %5172 = vst [vmem:[#allocation11_spill] sm:$0xff] %v4908_v31  ;;  %v4911_v36 = vpop.f32.mrb[105].mxu1 }
 0x213   :  { %3518 = vmatprep.mubr.msk.bf16.mxu1 %vm2321_vm2, %v2276_v2  ;;  %5173 = vst [vmem:[#allocation12_spill] sm:$0xff] %v4911_v36  ;;  %v4913_v32 = vpop.f32.mrb[106].mxu1 }
 0x214   :  { %v1810_v1 = vpop.f32.mrb[44].mxu0  ;;  %5174 = vst [vmem:[#allocation13_spill] sm:$0xff] %v4913_v32  ;;  %v4916_v2 = vpop.f32.mrb[107].mxu1 }
 0x215   :  { %v2100_v47 = vadd.f32 %v4736_v6, %v1810_v1  ;;  %v1812_v8 = vpop.f32.mrb[45].mxu0 }
 0x216   :  { %v1813_v63 = vpop.f32.mrb[46].mxu0 }
 0x217   :  { %v2103_v54 = vadd.f32 %v4746_v13, %v1813_v63  ;;  %v1815_v43 = vpop.f32.mrb[47].mxu0 }
 0x219   :  { %v2277_v4 = vpack.c.bf16 %v2103_v54, %v2100_v47 }
 0x21b   :  { %3519 = vmatmul.mubr.msk.bf16.gmra.mrb[128].mxu1 %vm2321_vm2, %v2277_v4 }
 0x21c   :  { %v1818_v6 = vpop.f32.mrb[48].mxu0 }
 0x21d   :  { %v2108_v59 = vadd.f32 %v4755_v21, %v1818_v6  ;;  %v1820_v13 = vpop.f32.mrb[49].mxu0 }
 0x21e   :  { %v1821_v1 = vpop.f32.mrb[50].mxu0 }
 0x21f   :  { %v2111_v8 = vadd.f32 %v4762_v27, %v1821_v1  ;;  %v1823_v47 = vpop.f32.mrb[51].mxu0 }
 0x221   :  { %v2278_v63 = vpack.c.bf16 %v2111_v8, %v2108_v59 }
 0x223   :  { %3522 = vmatprep.mubr.msk.bf16.mxu1 %vm2321_vm2, %v2278_v63 }
 0x224   :  { %v1826_v54 = vpop.f32.mrb[52].mxu0 }
 0x225   :  { %v2116_v43 = vadd.f32 %v4750_v15, %v1826_v54  ;;  %v1828_v4 = vpop.f32.mrb[53].mxu0 }
 0x226   :  { %v1829_v31 = vpop.f32.mrb[54].mxu0 }
 0x227   :  { %v2119_v36 = vadd.f32 %v4760_v24, %v1829_v31  ;;  %v1831_v32 = vpop.f32.mrb[55].mxu0 }
 0x229   :  { %v2279_v14 = vpack.c.bf16 %v2119_v36, %v2116_v43 }
 0x22b   :  { %3523 = vmatmul.mubr.msk.bf16.gmra.mrb[132].mxu1 %vm2321_vm2, %v2279_v14 }
 0x22c   :  { %v1834_v21 = vpop.f32.mrb[56].mxu0 }
 0x22d   :  { %v2124_v6 = vadd.f32 %v4772_v40, %v1834_v21  ;;  %v1836_v13 = vpop.f32.mrb[57].mxu0 }
 0x22e   :  { %v1837_v27 = vpop.f32.mrb[58].mxu0 }
 0x22f   :  { %v2127_v59 = vadd.f32 %v4782_v56, %v1837_v27  ;;  %v1839_v1 = vpop.f32.mrb[59].mxu0 }
 0x231   :  { %v2280_v8 = vpack.c.bf16 %v2127_v59, %v2124_v6 }
 0x233   :  { %3526 = vmatprep.mubr.msk.bf16.mxu1 %vm2321_vm2, %v2280_v8 }
 0x234   :  { %v1842_v15 = vpop.f32.mrb[60].mxu0 }
 0x235   :  { %v2132_v47 = vadd.f32 %v4770_v37, %v1842_v15  ;;  %v1844_v63 = vpop.f32.mrb[61].mxu0 }
 0x236   :  { %v1845_v24 = vpop.f32.mrb[62].mxu0 }
 0x237   :  { %v2135_v31 = vadd.f32 %v4777_v48, %v1845_v24  ;;  %v1847_v36 = vpop.f32.mrb[63].mxu0 }
 0x239   :  { %v2281_v14 = vpack.c.bf16 %v2135_v31, %v2132_v47 }
 0x23b   :  { %3527 = vmatmul.mubr.msk.bf16.gmra.mrb[136].mxu1 %vm2321_vm2, %v2281_v14 }
 0x23c   :  { %v1850_v40 = vpop.f32.mrb[64].mxu0 }
 0x23d   :  { %v2140_v32 = vadd.f32 %v4792_v18, %v1850_v40  ;;  %v1852_v54 = vpop.f32.mrb[65].mxu0 }
 0x23e   :  { %v1853_v56 = vpop.f32.mrb[66].mxu0 }
 0x23f   :  { %v2143_v43 = vadd.f32 %v4803_v25, %v1853_v56  ;;  %v1855_v4 = vpop.f32.mrb[67].mxu0 }
 0x241   :  { %v2282_v21 = vpack.c.bf16 %v2143_v43, %v2140_v32 }
 0x243   :  { %3530 = vmatprep.mubr.msk.bf16.mxu1 %vm2321_vm2, %v2282_v21 }
 0x244   :  { %v1858_v37 = vpop.f32.mrb[68].mxu0 }
 0x245   :  { %v2148_v6 = vadd.f32 %v4790_v7, %v1858_v37  ;;  %v1860_v13 = vpop.f32.mrb[69].mxu0 }
 0x246   :  { %v1861_v48 = vpop.f32.mrb[70].mxu0 }
 0x247   :  { %v2151_v27 = vadd.f32 %v4798_v45, %v1861_v48  ;;  %v1863_v59 = vpop.f32.mrb[71].mxu0 }
 0x249   :  { %v2283_v1 = vpack.c.bf16 %v2151_v27, %v2148_v6 }
 0x24b   :  { %3531 = vmatmul.mubr.msk.bf16.gmra.mrb[140].mxu1 %vm2321_vm2, %v2283_v1 }
 0x24c   :  { %v1866_v18 = vpop.f32.mrb[72].mxu0 }
 0x24d   :  { %v2156_v8 = vadd.f32 %v4818_v28, %v1866_v18  ;;  %v1868_v15 = vpop.f32.mrb[73].mxu0 }
 0x24e   :  { %v1869_v25 = vpop.f32.mrb[74].mxu0 }
 0x24f   :  { %v2159_v47 = vadd.f32 %v4829_v33, %v1869_v25  ;;  %v1871_v63 = vpop.f32.mrb[75].mxu0 }
 0x251   :  { %v2284_v24 = vpack.c.bf16 %v2159_v47, %v2156_v8 }
 0x253   :  { %3534 = vmatprep.mubr.msk.bf16.mxu1 %vm2321_vm2, %v2284_v24 }
 0x254   :  { %v1874_v7 = vpop.f32.mrb[76].mxu0 }
 0x255   :  { %v2164_v31 = vadd.f32 %v4815_v53, %v1874_v7  ;;  %v1876_v36 = vpop.f32.mrb[77].mxu0 }
 0x256   :  { %v1877_v45 = vpop.f32.mrb[78].mxu0 }
 0x257   :  { %v2167_v14 = vadd.f32 %v4824_v29, %v1877_v45  ;;  %v1879_v40 = vpop.f32.mrb[79].mxu0 }
 0x259   :  { %v2285_v32 = vpack.c.bf16 %v2167_v14, %v2164_v31 }
 0x25b   :  { %3535 = vmatmul.mubr.msk.bf16.gmra.mrb[144].mxu1 %vm2321_vm2, %v2285_v32 }
 0x25c   :  { %v1882_v28 = vpop.f32.mrb[80].mxu0 }
 0x25d   :  { %v2172_v54 = vadd.f32 %v4844_v0, %v1882_v28  ;;  %v1884_v56 = vpop.f32.mrb[81].mxu0 }
 0x25e   :  { %v1885_v33 = vpop.f32.mrb[82].mxu0 }
 0x25f   :  { %v2175_v43 = vadd.f32 %v4852_v23, %v1885_v33  ;;  %v1887_v4 = vpop.f32.mrb[83].mxu0 }
 0x261   :  { %v2286_v21 = vpack.c.bf16 %v2175_v43, %v2172_v54 }
 0x263   :  { %3538 = vmatprep.mubr.msk.bf16.mxu1 %vm2321_vm2, %v2286_v21 }
 0x264   :  { %v1890_v53 = vpop.f32.mrb[84].mxu0 }
 0x265   :  { %v1891_v37 = vadd.f32 %v1890_v53, %v4510_v9  ;;  %v1892_v6 = vpop.f32.mrb[85].mxu0 }
 0x266   :  { %v1893_v29 = vpop.f32.mrb[86].mxu0 }
 0x267   :  { %v2180_v13 = vadd.f32 %v4841_v10, %v1891_v37  ;;  %v1894_v48 = vadd.f32 %v1893_v29, %v4518_v12  ;;  %v1895_v27 = vpop.f32.mrb[87].mxu0 }
 0x269   :  { %v2183_v0 = vadd.f32 %v4850_v39, %v1894_v48 }
 0x26b   :  { %v2287_v59 = vpack.c.bf16 %v2183_v0, %v2180_v13 }
 0x26c   :  { %v1898_v1 = vpop.f32.mrb[88].mxu0 }
 0x26d   :  { %v1899_v23 = vadd.f32 %v1898_v1, %v4528_v16  ;;  %v1900_v18 = vpop.f32.mrb[89].mxu0  ;;  %3539 = vmatmul.mubr.msk.bf16.gmra.mrb[148].mxu1 %vm2321_vm2, %v2287_v59  ;;  %v5175_v1 = vld [vmem:[#allocation2_spill] sm:$0xff] }
 0x26e   :  { %v1901_v8 = vpop.f32.mrb[90].mxu0 }
 0x26f   :  { %v1902_v15 = vadd.f32 %v1901_v8, %v4536_v20  ;;  %v2188_v9 = vadd.f32 %v4862_v19, %v1899_v23  ;;  %v1903_v25 = vpop.f32.mrb[91].mxu0 }
 0x271   :  { %v2191_v10 = vadd.f32 %v4867_v17, %v1902_v15 }
 0x273   :  { %v2288_v47 = vpack.c.bf16 %v2191_v10, %v2188_v9 }
 0x274   :  { %v1906_v12 = vpop.f32.mrb[92].mxu0 }
 0x275   :  { %v1907_v63 = vadd.f32 %v1906_v12, %v4538_v22  ;;  %v1908_v39 = vpop.f32.mrb[93].mxu0  ;;  %3542 = vmatprep.mubr.msk.bf16.mxu1 %vm2321_vm2, %v2288_v47 }
 0x276   :  { %v1909_v24 = vpop.f32.mrb[94].mxu0 }
 0x277   :  { %v2196_v16 = vadd.f32 %v4860_v41, %v1907_v63  ;;  %v1910_v7 = vadd.f32 %v1909_v24, %v4546_v26  ;;  %v1911_v31 = vpop.f32.mrb[95].mxu0 }
 0x279   :  { %v2199_v20 = vadd.f32 %v4865_v5, %v1910_v7 }
 0x27b   :  { %v2289_v36 = vpack.c.bf16 %v2199_v20, %v2196_v16 }
 0x27c   :  { %v1914_v19 = vpop.f32.mrb[96].mxu0 }
 0x27d   :  { %v1915_v45 = vadd.f32 %v1914_v19, %v4556_v30  ;;  %v1916_v17 = vpop.f32.mrb[97].mxu0  ;;  %3543 = vmatmul.mubr.msk.bf16.gmra.mrb[152].mxu1 %vm2321_vm2, %v2289_v36 }
 0x27e   :  { %v1917_v14 = vpop.f32.mrb[98].mxu0 }
 0x27f   :  { %v1918_v22 = vadd.f32 %v1917_v14, %v4564_v34  ;;  %v2204_v40 = vadd.f32 %v4876_v11, %v1915_v45  ;;  %v1919_v32 = vpop.f32.mrb[99].mxu0  ;;  %v5177_v45 = vld [vmem:[#allocation4_spill] sm:$0xff] }
 0x280   :  { %v5178_v32 = vld [vmem:[#allocation5_spill] sm:$0xff] }
 0x281   :  { %v2207_v41 = vadd.f32 %v4881_v49, %v1918_v22 }
 0x283   :  { %v2290_v28 = vpack.c.bf16 %v2207_v41, %v2204_v40 }
 0x284   :  { %v1922_v26 = vpop.f32.mrb[100].mxu0 }
 0x285   :  { %v1923_v54 = vadd.f32 %v1922_v26, %v4574_v38  ;;  %v1924_v5 = vpop.f32.mrb[101].mxu0  ;;  %3546 = vmatprep.mubr.msk.bf16.mxu1 %vm2321_vm2, %v2290_v28  ;;  %v5179_v26 = vld [vmem:[#allocation10_spill] sm:$0xff] }
 0x286   :  { %v1925_v56 = vpop.f32.mrb[102].mxu0 }
 0x287   :  { %v2212_v30 = vadd.f32 %v4874_v51, %v1923_v54  ;;  %v1926_v33 = vadd.f32 %v1925_v56, %v4582_v42  ;;  %v1927_v43 = vpop.f32.mrb[103].mxu0 }
 0x289   :  { %v2215_v34 = vadd.f32 %v4879_v44, %v1926_v33 }
 0x28b   :  { %v2291_v4 = vpack.c.bf16 %v2215_v34, %v2212_v30  ;;  %v5180_v30 = vld [vmem:[#allocation6_spill] sm:$0xff] }
 0x28c   :  { %v1930_v11 = vpop.f32.mrb[104].mxu0 }
 0x28d   :  { %v1931_v21 = vadd.f32 %v1930_v11, %v4592_v46  ;;  %v1932_v49 = vpop.f32.mrb[105].mxu0  ;;  %3547 = vmatmul.mubr.msk.bf16.gmra.mrb[156].mxu1 %vm2321_vm2, %v2291_v4  ;;  %v5181_v11 = vld [vmem:[#allocation12_spill] sm:$0xff] }
 0x28e   :  { %v1933_v53 = vpop.f32.mrb[106].mxu0  ;;  %v5182_v49 = vld [vmem:[#allocation7_spill] sm:$0xff] }
 0x28f   :  { %v1934_v38 = vadd.f32 %v1933_v53, %v4600_v50  ;;  %v2220_v37 = vadd.f32 %v4890_v62, %v1931_v21  ;;  %v1935_v6 = vpop.f32.mrb[107].mxu0 }
 0x291   :  { %v2223_v51 = vadd.f32 %v4895_v57, %v1934_v38  ;;  %v4981_v57 = vld [vmem:[%s5158_s3] ss:$0 sm:$0xff] }
 0x293   :  { %v2292_v29 = vpack.c.bf16 %v2223_v51, %v2220_v37 }
 0x294   :  { %v1938_v42 = vpop.f32.mrb[108].mxu0 }
 0x295   :  { %v1939_v13 = vadd.f32 %v1938_v42, %v4613_v55  ;;  %v1940_v44 = vpop.f32.mrb[109].mxu0  ;;  %3550 = vmatprep.mubr.msk.bf16.mxu1 %vm2321_vm2, %v2292_v29 }
 0x296   :  { %v1941_v48 = vpop.f32.mrb[110].mxu0 }
 0x297   :  { %v2228_v46 = vadd.f32 %v4888_v35, %v1939_v13  ;;  %v1942_v27 = vadd.f32 %v1941_v48, %v4624_v60  ;;  %v1943_v0 = vpop.f32.mrb[111].mxu0  ;;  %v5176_v60 = vld [vmem:[#allocation3_spill] sm:$0xff] }
 0x299   :  { %v2231_v50 = vadd.f32 %v4893_v52, %v1942_v27 }
 0x29b   :  { %v2293_v59 = vpack.c.bf16 %v2231_v50, %v2228_v46 }
 0x29c   :  { %v1946_v62 = vpop.f32.mrb[112].mxu0 }
 0x29d   :  { %v1947_v55 = vadd.f32 %v1946_v62, %v5175_v1  ;;  %v1948_v23 = vpop.f32.mrb[113].mxu0  ;;  %3551 = vmatmul.mubr.msk.bf16.gmra.mrb[160].mxu1 %vm2321_vm2, %v2293_v59  ;;  %v5183_v1 = vld [vmem:[#allocation8_spill] sm:$0xff] }
 0x29e   :  { %v1949_v18 = vpop.f32.mrb[114].mxu0  ;;  %v3500_v8 = vpop.f32.mrb[108].mxu1 }
 0x29f   :  { %v2236_v35 = vadd.f32 %v4902_v61, %v1947_v55  ;;  %v1950_v15 = vadd.f32 %v1949_v18, %v5176_v60  ;;  %v2461_v52 = vadd.f32 %v3500_v8, %v4981_v57  ;;  %v1951_v9 = vpop.f32.mrb[115].mxu0  ;;  %v2452_v25 = vpop.f32.mrb[109].mxu1  ;;  %v5184_v8 = vld [vmem:[#allocation11_spill] sm:$0xff]  ;;  %v5185_v60 = vld [vmem:[#allocation9_spill] sm:$0xff] }
 0x2a0   :  { %v2453_v10 = vadd.f32 %v4981_v57, %v2452_v25  ;;  %v3501_v47 = vpop.f32.mrb[110].mxu1  ;;  %v5186_v9 = vld [vmem:[#allocation13_spill] sm:$0xff] }
 0x2a1   :  { %v2239_v12 = vadd.f32 %v4906_v58, %v1950_v15  ;;  %v2464_v63 = vadd.f32 %v3501_v47, %v4981_v57  ;;  %v2455_v39 = vpop.f32.mrb[111].mxu1  ;;  %v2709_v7 = vmax.f32 %v2461_v52, 0.0 }
 0x2a2   :  { %v2456_v24 = vadd.f32 %v4981_v57, %v2455_v39  ;;  %v2707_v61 = vmax.f32 %v2453_v10, 0.0 }
 0x2a3   :  { %v2294_v16 = vpack.c.bf16 %v2239_v12, %v2236_v35  ;;  %v2710_v31 = vmax.f32 %v2464_v63, 0.0 }
 0x2a4   :  { %v2708_v20 = vmax.f32 %v2456_v24, 0.0  ;;  %v1954_v36 = vpop.f32.mrb[116].mxu0 }
 0x2a5   :  { %v4992_v19 = vpack.c.bf16 %v2710_v31, %v2709_v7  ;;  %v1955_v17 = vadd.f32 %v1954_v36, %v5177_v45  ;;  %v1956_v14 = vpop.f32.mrb[117].mxu0  ;;  %3554 = vmatprep.mubr.msk.bf16.mxu1 %vm2321_vm2, %v2294_v16 }
 0x2a6   :  { %v4996_v22 = vpack.c.bf16 %v2708_v20, %v2707_v61  ;;  %v1957_v58 = vpop.f32.mrb[118].mxu0 }
 0x2a7   :  { %v2244_v40 = vadd.f32 %v4899_v3, %v1955_v17  ;;  %v1958_v41 = vadd.f32 %v1957_v58, %v5178_v32  ;;  %v1959_v28 = vpop.f32.mrb[119].mxu0 }
 0x2a9   :  { %v2247_v54 = vadd.f32 %v5179_v26, %v1958_v41 }
 0x2ab   :  { %v2295_v5 = vpack.c.bf16 %v2247_v54, %v2244_v40 }
 0x2ac   :  { %v1962_v56 = vpop.f32.mrb[120].mxu0 }
 0x2ad   :  { %v1963_v33 = vadd.f32 %v1962_v56, %v5180_v30  ;;  %v1964_v43 = vpop.f32.mrb[121].mxu0  ;;  %3555 = vmatmul.mubr.msk.bf16.gmra.mrb[164].mxu1 %vm2321_vm2, %v2295_v5 }
 0x2ae   :  { %v1965_v34 = vpop.f32.mrb[122].mxu0  ;;  %v3504_v4 = vpop.f32.mrb[112].mxu1 }
 0x2af   :  { %v2252_v21 = vadd.f32 %v5181_v11, %v1963_v33  ;;  %v1966_v53 = vadd.f32 %v1965_v34, %v5182_v49  ;;  %v2477_v3 = vadd.f32 %v3504_v4, %v4981_v57  ;;  %v1967_v38 = vpop.f32.mrb[123].mxu0  ;;  %v2468_v37 = vpop.f32.mrb[113].mxu1 }
 0x2b0   :  { %v2469_v6 = vadd.f32 %v4981_v57, %v2468_v37  ;;  %v3505_v51 = vpop.f32.mrb[114].mxu1 }
 0x2b1   :  { %v2255_v29 = vadd.f32 %v4916_v2, %v1966_v53  ;;  %v2480_v42 = vadd.f32 %v3505_v51, %v4981_v57  ;;  %v2471_v13 = vpop.f32.mrb[115].mxu1  ;;  %v2713_v46 = vmax.f32 %v2477_v3, 0.0  ;;  %v3995_v51 = vmov 1966171168  }
 0x2b2   :  { %v2472_v44 = vadd.f32 %v4981_v57, %v2471_v13  ;;  %v2711_v0 = vmax.f32 %v2469_v6, 0.0 }
 0x2b3   :  { %v2296_v48 = vpack.c.bf16 %v2255_v29, %v2252_v21  ;;  %v2714_v27 = vmax.f32 %v2480_v42, 0.0  ;;  %v2814_v29 = vunpack.c.l.s4 %v3995_v51  ;;  %v2816_v42 = vlaneseq }
 0x2b4   :  { %v2712_v50 = vmax.f32 %v2472_v44, 0.0  ;;  %v1970_v59 = vpop.f32.mrb[124].mxu0 }
 0x2b5   :  { %v5010_v62 = vpack.c.bf16 %v2714_v27, %v2713_v46  ;;  %v1971_v55 = vadd.f32 %v1970_v59, %v5183_v1  ;;  %v1972_v23 = vpop.f32.mrb[125].mxu0  ;;  %3558 = vmatprep.mubr.msk.bf16.mxu1 %vm2321_vm2, %v2296_v48  ;;  %v2815_v27 = vunpack.c.0.s8 %v2814_v29  ;;  %v5043_v59 = vld.sshfl [vmem:[%s5159_s4] sm:$0x33 pattern:$0x75316420] }
 0x2b6   :  { %v5014_v18 = vpack.c.bf16 %v2712_v50, %v2711_v0  ;;  %v1973_v2 = vpop.f32.mrb[126].mxu0  ;;  %v2817_v0 = vshrl.u32 %v2816_v42, 7 }
 0x2b7   :  { %v2260_v35 = vadd.f32 %v5184_v8, %v1971_v55  ;;  %v1974_v15 = vadd.f32 %v1973_v2, %v5185_v60  ;;  %v1975_v52 = vpop.f32.mrb[127].mxu0  ;;  %v2812_v55 = vcombine.high %v5043_v59, %v5043_v59 }
 0x2b8   :  { %v2818_v23 = vsub.s32 %v2815_v27, %v2817_v0 }
 0x2b9   :  { %v2263_v25 = vadd.f32 %v5186_v9, %v1974_v15 }
 0x2ba   :  { %v5047_v2 = vrot.slane %v2812_v55, %v2818_v23 }
 0x2bb   :  { %v2297_v10 = vpack.c.bf16 %v2263_v25, %v2260_v35 }
 0x2bc   :  { %v2828_v51 = vcombine.high %v5047_v2, %v5047_v2 }
 0x2bd   :  { %3559 = vmatmul.mubr.msk.bf16.gmra.mrb[168].mxu1 %vm2321_vm2, %v2297_v10 }
 0x2be   :  { %v3508_v47 = vpop.f32.mrb[116].mxu1  ;;  %2865 = vmatprep.mubr.bf16.mxu1 %v5047_v2 }
 0x2bf   :  { %v2493_v12 = vadd.f32 %v3508_v47, %v4981_v57  ;;  %v2484_v63 = vpop.f32.mrb[117].mxu1 }
 0x2c0   :  { %v2485_v39 = vadd.f32 %v4981_v57, %v2484_v63  ;;  %v3509_v24 = vpop.f32.mrb[118].mxu1 }
 0x2c1   :  { %v2496_v16 = vadd.f32 %v3509_v24, %v4981_v57  ;;  %v2487_v7 = vpop.f32.mrb[119].mxu1  ;;  %v2717_v61 = vmax.f32 %v2493_v12, 0.0 }
 0x2c2   :  { %v2488_v31 = vadd.f32 %v4981_v57, %v2487_v7  ;;  %v2715_v36 = vmax.f32 %v2485_v39, 0.0 }
 0x2c3   :  { %v2718_v20 = vmax.f32 %v2496_v16, 0.0 }
 0x2c4   :  { %v2716_v45 = vmax.f32 %v2488_v31, 0.0 }
 0x2c5   :  { %v5024_v17 = vpack.c.bf16 %v2718_v20, %v2717_v61 }
 0x2c6   :  { %v5026_v14 = vpack.c.bf16 %v2716_v45, %v2715_v36 }
 0x2ce   :  { %v3512_v58 = vpop.f32.mrb[120].mxu1 }
 0x2cf   :  { %v2509_v40 = vadd.f32 %v3512_v58, %v4981_v57  ;;  %v2500_v32 = vpop.f32.mrb[121].mxu1 }
 0x2d0   :  { %v2501_v41 = vadd.f32 %v4981_v57, %v2500_v32  ;;  %v3513_v28 = vpop.f32.mrb[122].mxu1 }
 0x2d1   :  { %v2512_v26 = vadd.f32 %v3513_v28, %v4981_v57  ;;  %v2503_v54 = vpop.f32.mrb[123].mxu1  ;;  %v2721_v56 = vmax.f32 %v2509_v40, 0.0 }
 0x2d2   :  { %v2504_v5 = vadd.f32 %v4981_v57, %v2503_v54  ;;  %v2719_v33 = vmax.f32 %v2501_v41, 0.0 }
 0x2d3   :  { %v2722_v30 = vmax.f32 %v2512_v26, 0.0 }
 0x2d4   :  { %v2720_v43 = vmax.f32 %v2504_v5, 0.0 }
 0x2d5   :  { %v5032_v34 = vpack.c.bf16 %v2722_v30, %v2721_v56 }
 0x2d6   :  { %v5034_v4 = vpack.c.bf16 %v2720_v43, %v2719_v33 }
 0x2de   :  { %v3516_v11 = vpop.f32.mrb[124].mxu1 }
 0x2df   :  { %v2525_v21 = vadd.f32 %v3516_v11, %v4981_v57  ;;  %v2516_v49 = vpop.f32.mrb[125].mxu1 }
 0x2e0   :  { %v2517_v53 = vadd.f32 %v4981_v57, %v2516_v49  ;;  %v3517_v3 = vpop.f32.mrb[126].mxu1 }
 0x2e1   :  { %v2528_v38 = vadd.f32 %v3517_v3, %v4981_v57  ;;  %v2519_v37 = vpop.f32.mrb[127].mxu1  ;;  %v2725_v13 = vmax.f32 %v2525_v21, 0.0 }
 0x2e2   :  { %v2520_v6 = vadd.f32 %v4981_v57, %v2519_v37  ;;  %v2723_v48 = vmax.f32 %v2517_v53, 0.0 }
 0x2e3   :  { %v2726_v44 = vmax.f32 %v2528_v38, 0.0 }
 0x2e4   :  { %v2724_v46 = vmax.f32 %v2520_v6, 0.0 }
 0x2e5   :  { %v2781_v50 = vpack.c.bf16 %v2726_v44, %v2725_v13 }
 0x2e6   :  { %v2780_v1 = vpack.c.bf16 %v2724_v46, %v2723_v48 }
 0x2e8   :  { %3371 = vmatprep.subr.bf16.mxu1 %v2780_v1 }
 0x2e9   :  { %3372 = vmatpush3.bf16.msra.mxu1 %v4996_v22 }
 0x2ea   :  { %3373 = vmatprep.subr.bf16.mxu1 %v2781_v50 }
 0x2ed   :  { %3374 = vmatpush3.bf16.msra.mxu1 %v4992_v19 }
 0x2ee   :  { %v3520_v8 = vpop.f32.mrb[128].mxu1 }
 0x2ef   :  { %v2541_v35 = vadd.f32 %v3520_v8, %v4981_v57  ;;  %v2532_v60 = vpop.f32.mrb[129].mxu1 }
 0x2f0   :  { %v2533_v15 = vadd.f32 %v4981_v57, %v2532_v60  ;;  %v3521_v52 = vpop.f32.mrb[130].mxu1 }
 0x2f1   :  { %v2544_v9 = vadd.f32 %v3521_v52, %v4981_v57  ;;  %v2535_v25 = vpop.f32.mrb[131].mxu1  ;;  %v2729_v47 = vmax.f32 %v2541_v35, 0.0 }
 0x2f2   :  { %v2536_v10 = vadd.f32 %v4981_v57, %v2535_v25  ;;  %v2727_v22 = vmax.f32 %v2533_v15, 0.0 }
 0x2f3   :  { %v2730_v12 = vmax.f32 %v2544_v9, 0.0 }
 0x2f4   :  { %v2728_v63 = vmax.f32 %v2536_v10, 0.0 }
 0x2f5   :  { %v2783_v39 = vpack.c.bf16 %v2730_v12, %v2729_v47 }
 0x2f6   :  { %v2782_v24 = vpack.c.bf16 %v2728_v63, %v2727_v22 }
 0x2f8   :  { %3375 = vmatprep.subr.bf16.mxu1 %v2782_v24 }
 0x2f9   :  { %3376 = vmatpush3.bf16.msra.mxu1 %v5014_v18 }
 0x2fa   :  { %3377 = vmatprep.subr.bf16.mxu1 %v2783_v39 }
 0x2fd   :  { %3378 = vmatpush3.bf16.msra.mxu1 %v5010_v62 }
 0x2fe   :  { %v3524_v19 = vpop.f32.mrb[132].mxu1 }
 0x2ff   :  { %v2557_v16 = vadd.f32 %v3524_v19, %v4981_v57  ;;  %v2548_v7 = vpop.f32.mrb[133].mxu1 }
 0x300   :  { %v2549_v31 = vadd.f32 %v4981_v57, %v2548_v7  ;;  %v3525_v61 = vpop.f32.mrb[134].mxu1 }
 0x301   :  { %v2560_v20 = vadd.f32 %v3525_v61, %v4981_v57  ;;  %v2551_v36 = vpop.f32.mrb[135].mxu1  ;;  %v2733_v58 = vmax.f32 %v2557_v16, 0.0 }
 0x302   :  { %v2552_v45 = vadd.f32 %v4981_v57, %v2551_v36  ;;  %v2731_v32 = vmax.f32 %v2549_v31, 0.0 }
 0x303   :  { %v2734_v40 = vmax.f32 %v2560_v20, 0.0 }
 0x304   :  { %v2732_v41 = vmax.f32 %v2552_v45, 0.0 }
 0x305   :  { %v2785_v18 = vpack.c.bf16 %v2734_v40, %v2733_v58 }
 0x306   :  { %v2784_v28 = vpack.c.bf16 %v2732_v41, %v2731_v32 }
 0x308   :  { %3379 = vmatprep.subr.bf16.mxu1 %v2784_v28 }
 0x309   :  { %3380 = vmatpush3.bf16.msra.mxu1 %v5026_v14 }
 0x30a   :  { %3381 = vmatprep.subr.bf16.mxu1 %v2785_v18 }
 0x30d   :  { %3382 = vmatpush3.bf16.msra.mxu1 %v5024_v17  ;;  %v5070_v17 = vrot.slane %v5043_v59, %v2818_v23 }
 0x30e   :  { %v3528_v62 = vpop.f32.mrb[136].mxu1 }
 0x30f   :  { %v2573_v26 = vadd.f32 %v3528_v62, %v4981_v57  ;;  %v2564_v54 = vpop.f32.mrb[137].mxu1 }
 0x310   :  { %v2565_v5 = vadd.f32 %v4981_v57, %v2564_v54  ;;  %v3529_v56 = vpop.f32.mrb[138].mxu1 }
 0x311   :  { %v2576_v30 = vadd.f32 %v3529_v56, %v4981_v57  ;;  %v2567_v33 = vpop.f32.mrb[139].mxu1  ;;  %v2737_v11 = vmax.f32 %v2573_v26, 0.0 }
 0x312   :  { %v2568_v43 = vadd.f32 %v4981_v57, %v2567_v33  ;;  %v2735_v49 = vmax.f32 %v2565_v5, 0.0 }
 0x313   :  { %v2738_v21 = vmax.f32 %v2576_v30, 0.0 }
 0x314   :  { %v2736_v53 = vmax.f32 %v2568_v43, 0.0 }
 0x315   :  { %v2787_v14 = vpack.c.bf16 %v2738_v21, %v2737_v11 }
 0x316   :  { %v2786_v3 = vpack.c.bf16 %v2736_v53, %v2735_v49 }
 0x318   :  { %3383 = vmatprep.subr.bf16.mxu1 %v2786_v3 }
 0x319   :  { %3384 = vmatpush3.bf16.msra.mxu1 %v5034_v4 }
 0x31a   :  { %3385 = vmatprep.subr.bf16.mxu1 %v2787_v14 }
 0x31d   :  { %3386 = vmatpush3.bf16.msra.mxu1 %v5032_v34 }
 0x31e   :  { %v3532_v38 = vpop.f32.mrb[140].mxu1 }
 0x31f   :  { %v2589_v37 = vadd.f32 %v3532_v38, %v4981_v57  ;;  %v2580_v6 = vpop.f32.mrb[141].mxu1 }
 0x320   :  { %v2581_v29 = vadd.f32 %v4981_v57, %v2580_v6  ;;  %v3533_v42 = vpop.f32.mrb[142].mxu1  ;;  %2866 = vmatmul.mubr.bf16.vlgmr.msra.gmra.mrb[172].mxu1 %v5070_v17 }
 0x321   :  { %v2592_v4 = vadd.f32 %v3533_v42, %v4981_v57  ;;  %v2583_v13 = vpop.f32.mrb[143].mxu1  ;;  %2905 = vmatprep.mubr.bf16.mxu1 %v2828_v51  ;;  %v2741_v48 = vmax.f32 %v2589_v37, 0.0 }
 0x322   :  { %v2584_v44 = vadd.f32 %v4981_v57, %v2583_v13  ;;  %v2739_v46 = vmax.f32 %v2581_v29, 0.0 }
 0x323   :  { %v2742_v34 = vmax.f32 %v2592_v4, 0.0 }
 0x324   :  { %v2740_v27 = vmax.f32 %v2584_v44, 0.0 }
 0x325   :  { %v2789_v0 = vpack.c.bf16 %v2742_v34, %v2741_v48 }
 0x326   :  { %v2788_v50 = vpack.c.bf16 %v2740_v27, %v2739_v46 }
 0x32e   :  { %v3536_v59 = vpop.f32.mrb[144].mxu1 }
 0x32f   :  { %v2605_v1 = vadd.f32 %v3536_v59, %v4981_v57  ;;  %v2596_v55 = vpop.f32.mrb[145].mxu1 }
 0x330   :  { %v2597_v23 = vadd.f32 %v4981_v57, %v2596_v55  ;;  %v3537_v2 = vpop.f32.mrb[146].mxu1 }
 0x331   :  { %v2608_v8 = vadd.f32 %v3537_v2, %v4981_v57  ;;  %v2599_v35 = vpop.f32.mrb[147].mxu1  ;;  %v2745_v15 = vmax.f32 %v2605_v1, 0.0 }
 0x332   :  { %v2600_v60 = vadd.f32 %v4981_v57, %v2599_v35  ;;  %v2743_v9 = vmax.f32 %v2597_v23, 0.0 }
 0x333   :  { %v2746_v52 = vmax.f32 %v2608_v8, 0.0 }
 0x334   :  { %v2744_v25 = vmax.f32 %v2600_v60, 0.0 }
 0x335   :  { %v5084_v10 = vpack.c.bf16 %v2746_v52, %v2745_v15 }
 0x336   :  { %v2790_v47 = vpack.c.bf16 %v2744_v25, %v2743_v9 }
 0x340   :  { %v3540_v12 = vpop.f32.mrb[148].mxu1 }
 0x341   :  { %v2621_v22 = vadd.f32 %v3540_v12, %v4981_v57  ;;  %v2612_v63 = vpop.f32.mrb[149].mxu1 }
 0x342   :  { %v2613_v39 = vadd.f32 %v4981_v57, %v2612_v63  ;;  %v3541_v24 = vpop.f32.mrb[150].mxu1 }
 0x343   :  { %v2624_v19 = vadd.f32 %v3541_v24, %v4981_v57  ;;  %v2615_v16 = vpop.f32.mrb[151].mxu1  ;;  %v2749_v31 = vmax.f32 %v2621_v22, 0.0 }
 0x344   :  { %v2616_v7 = vadd.f32 %v4981_v57, %v2615_v16  ;;  %v2747_v20 = vmax.f32 %v2613_v39, 0.0 }
 0x345   :  { %v2750_v61 = vmax.f32 %v2624_v19, 0.0 }
 0x346   :  { %v2748_v36 = vmax.f32 %v2616_v7, 0.0 }
 0x347   :  { %v5090_v45 = vpack.c.bf16 %v2750_v61, %v2749_v31 }
 0x348   :  { %v5092_v58 = vpack.c.bf16 %v2748_v36, %v2747_v20 }
 0x350   :  { %v3544_v40 = vpop.f32.mrb[152].mxu1 }
 0x351   :  { %v2637_v32 = vadd.f32 %v3544_v40, %v4981_v57  ;;  %v2628_v41 = vpop.f32.mrb[153].mxu1 }
 0x352   :  { %v2629_v18 = vadd.f32 %v4981_v57, %v2628_v41  ;;  %v3545_v28 = vpop.f32.mrb[154].mxu1 }
 0x353   :  { %v2640_v62 = vadd.f32 %v3545_v28, %v4981_v57  ;;  %v2631_v26 = vpop.f32.mrb[155].mxu1  ;;  %v2753_v5 = vmax.f32 %v2637_v32, 0.0 }
 0x354   :  { %v2632_v54 = vadd.f32 %v4981_v57, %v2631_v26  ;;  %v2751_v30 = vmax.f32 %v2629_v18, 0.0 }
 0x355   :  { %v2754_v56 = vmax.f32 %v2640_v62, 0.0 }
 0x356   :  { %v2752_v33 = vmax.f32 %v2632_v54, 0.0 }
 0x357   :  { %v5098_v43 = vpack.c.bf16 %v2754_v56, %v2753_v5  ;;  %v3986_v56 = vld [vmem:[%s5160_s5] sm:$0xff]  }
 0x358   :  { %v5100_v11 = vpack.c.bf16 %v2752_v33, %v2751_v30  ;;  %v3987_v30 = vld [vmem:[%s5160_s5 + $0x8] sm:$0xff]   ;;  %v3989_v33 = vld [vmem:[%s5160_s5 + $0x18] sm:$0xff]  }
 0x360   :  { %v3548_v21 = vpop.f32.mrb[156].mxu1 }
 0x361   :  { %v2653_v49 = vadd.f32 %v3548_v21, %v4981_v57  ;;  %v2644_v53 = vpop.f32.mrb[157].mxu1 }
 0x362   :  { %v2645_v14 = vadd.f32 %v4981_v57, %v2644_v53  ;;  %v3549_v3 = vpop.f32.mrb[158].mxu1  ;;  %v3992_v53 = vld [vmem:[%s5160_s5 + $0x30] sm:$0xff]  }
 0x363   :  { %v2656_v38 = vadd.f32 %v3549_v3, %v4981_v57  ;;  %v2647_v37 = vpop.f32.mrb[159].mxu1  ;;  %v2757_v51 = vmax.f32 %v2653_v49, 0.0 }
 0x364   :  { %v2648_v6 = vadd.f32 %v4981_v57, %v2647_v37  ;;  %v2755_v42 = vmax.f32 %v2645_v14, 0.0  ;;  %v3993_v37 = vld [vmem:[%s5160_s5 + $0x38] sm:$0xff]  }
 0x365   :  { %v2758_v29 = vmax.f32 %v2656_v38, 0.0 }
 0x366   :  { %v2756_v4 = vmax.f32 %v2648_v6, 0.0 }
 0x367   :  { %v2797_v13 = vpack.c.bf16 %v2758_v29, %v2757_v51 }
 0x368   :  { %v2796_v44 = vpack.c.bf16 %v2756_v4, %v2755_v42 }
 0x36a   :  { %3393 = vmatprep.subr.bf16.mxu1 %v2796_v44 }
 0x36b   :  { %3394 = vmatpush3.bf16.msra.mxu1 %v2788_v50 }
 0x36c   :  { %3395 = vmatprep.subr.bf16.mxu1 %v2797_v13 }
 0x36f   :  { %3396 = vmatpush3.bf16.msra.mxu1 %v2789_v0 }
 0x370   :  { %v3552_v48 = vpop.f32.mrb[160].mxu1 }
 0x371   :  { %v2669_v34 = vadd.f32 %v3552_v48, %v4981_v57  ;;  %v2660_v46 = vpop.f32.mrb[161].mxu1  ;;  %v3293_v48 = vld [vmem:[%s5161_s6] ss:$0 sm:$0xff] }
 0x372   :  { %v2661_v27 = vadd.f32 %v4981_v57, %v2660_v46  ;;  %v3553_v59 = vpop.f32.mrb[162].mxu1 }
 0x373   :  { %v2672_v1 = vadd.f32 %v3553_v59, %v4981_v57  ;;  %v2663_v55 = vpop.f32.mrb[163].mxu1  ;;  %v2761_v2 = vmax.f32 %v2669_v34, 0.0 }
 0x374   :  { %v2664_v23 = vadd.f32 %v4981_v57, %v2663_v55  ;;  %v2759_v35 = vmax.f32 %v2661_v27, 0.0 }
 0x375   :  { %v2762_v8 = vmax.f32 %v2672_v1, 0.0 }
 0x376   :  { %v2760_v60 = vmax.f32 %v2664_v23, 0.0 }
 0x377   :  { %v2799_v15 = vpack.c.bf16 %v2762_v8, %v2761_v2 }
 0x378   :  { %v2798_v50 = vpack.c.bf16 %v2760_v60, %v2759_v35 }
 0x37a   :  { %3397 = vmatprep.subr.bf16.mxu1 %v2798_v50 }
 0x37b   :  { %3398 = vmatpush3.bf16.msra.mxu1 %v2790_v47 }
 0x37c   :  { %3399 = vmatprep.subr.bf16.mxu1 %v2799_v15 }
 0x37f   :  { %3400 = vmatpush3.bf16.msra.mxu1 %v5084_v10 }
 0x380   :  { %v3556_v0 = vpop.f32.mrb[164].mxu1 }
 0x381   :  { %v2685_v52 = vadd.f32 %v3556_v0, %v4981_v57  ;;  %v2676_v9 = vpop.f32.mrb[165].mxu1 }
 0x382   :  { %v2677_v25 = vadd.f32 %v4981_v57, %v2676_v9  ;;  %v3557_v12 = vpop.f32.mrb[166].mxu1 }
 0x383   :  { %v2688_v22 = vadd.f32 %v3557_v12, %v4981_v57  ;;  %v2679_v63 = vpop.f32.mrb[167].mxu1  ;;  %v2765_v24 = vmax.f32 %v2685_v52, 0.0 }
 0x384   :  { %v2680_v39 = vadd.f32 %v4981_v57, %v2679_v63  ;;  %v2763_v16 = vmax.f32 %v2677_v25, 0.0 }
 0x385   :  { %v2766_v19 = vmax.f32 %v2688_v22, 0.0 }
 0x386   :  { %v2764_v7 = vmax.f32 %v2680_v39, 0.0 }
 0x387   :  { %v2801_v47 = vpack.c.bf16 %v2766_v19, %v2765_v24 }
 0x388   :  { %v2800_v31 = vpack.c.bf16 %v2764_v7, %v2763_v16 }
 0x38a   :  { %3401 = vmatprep.subr.bf16.mxu1 %v2800_v31 }
 0x38b   :  { %3402 = vmatpush3.bf16.msra.mxu1 %v5092_v58 }
 0x38c   :  { %3403 = vmatprep.subr.bf16.mxu1 %v2801_v47 }
 0x38f   :  { %3404 = vmatpush3.bf16.msra.mxu1 %v5090_v45  ;;  %v2827_v45 = vcombine.high %v5070_v17, %v5070_v17  ;;  %v3988_v17 = vld [vmem:[%s5160_s5 + $0x10] sm:$0xff]  }
 0x390   :  { %v3560_v10 = vpop.f32.mrb[168].mxu1 }
 0x391   :  { %v2701_v61 = vadd.f32 %v3560_v10, %v4981_v57  ;;  %v2692_v20 = vpop.f32.mrb[169].mxu1 }
 0x392   :  { %v2693_v36 = vadd.f32 %v4981_v57, %v2692_v20  ;;  %v3561_v40 = vpop.f32.mrb[170].mxu1 }
 0x393   :  { %v2704_v32 = vadd.f32 %v3561_v40, %v4981_v57  ;;  %v2695_v41 = vpop.f32.mrb[171].mxu1  ;;  %v2769_v28 = vmax.f32 %v2701_v61, 0.0 }
 0x394   :  { %v2696_v18 = vadd.f32 %v4981_v57, %v2695_v41  ;;  %v2767_v26 = vmax.f32 %v2693_v36, 0.0  ;;  %v3996_v57 = vmov 0.0  }
 0x395   :  { %v2770_v62 = vmax.f32 %v2704_v32, 0.0 }
 0x396   :  { %v2768_v54 = vmax.f32 %v2696_v18, 0.0 }
 0x397   :  { %v2803_v58 = vpack.c.bf16 %v2770_v62, %v2769_v28 }
 0x398   :  { %v2802_v5 = vpack.c.bf16 %v2768_v54, %v2767_v26 }
 0x39a   :  { %3405 = vmatprep.subr.bf16.mxu1 %v2802_v5 }
 0x39b   :  { %3406 = vmatpush3.bf16.msra.mxu1 %v5100_v11  ;;  %v3991_v11 = vld [vmem:[%s5160_s5 + $0x28] sm:$0xff]  }
 0x39c   :  { %3407 = vmatprep.subr.bf16.mxu1 %v2803_v58 }
 0x39f   :  { %3408 = vmatpush3.bf16.msra.mxu1 %v5098_v43  ;;  %v3990_v43 = vld [vmem:[%s5160_s5 + $0x20] sm:$0xff]  }
 0x3a0   :  { %3562 = vmatprep.subr.bf16.mxu1 %v3996_v57 }
 0x3a2   :  { %2906 = vmatmul.mubr.bf16.vlgmr.msra.gmra.mrb[176].mxu1 %v2827_v45 }
 0x3a3   :  { %3563 = vmatpush3.bf16.msra.mxu1 %v3986_v56  ;;  %3578 = vmatprep.mubr.msk.bf16.mxu1 %vm3997_vm3, %v3996_v57 }
 0x3a4   :  { %3564 = vmatprep.subr.bf16.mxu1 %v3996_v57 }
 0x3a7   :  { %3565 = vmatpush3.bf16.msra.mxu1 %v3987_v30 }
 0x3a8   :  { %3566 = vmatprep.subr.bf16.mxu1 %v3996_v57 }
 0x3ab   :  { %3567 = vmatpush3.bf16.msra.mxu1 %v3988_v17 }
 0x3ac   :  { %3568 = vmatprep.subr.bf16.mxu1 %v3996_v57 }
 0x3af   :  { %3569 = vmatpush3.bf16.msra.mxu1 %v3989_v33 }
 0x3b0   :  { %3570 = vmatprep.subr.bf16.mxu1 %v3996_v57 }
 0x3b3   :  { %3571 = vmatpush3.bf16.msra.mxu1 %v3990_v43 }
 0x3b4   :  { %3572 = vmatprep.subr.bf16.mxu1 %v3996_v57 }
 0x3b7   :  { %3573 = vmatpush3.bf16.msra.mxu1 %v3991_v11 }
 0x3b8   :  { %3574 = vmatprep.subr.bf16.mxu1 %v3996_v57 }
 0x3bb   :  { %3575 = vmatpush3.bf16.msra.mxu1 %v3992_v53 }
 0x3bc   :  { %3576 = vmatprep.subr.bf16.mxu1 %v3996_v57 }
 0x3bf   :  { %3577 = vmatpush3.bf16.msra.mxu1 %v3993_v37 }
 0x3f3   :  { %v3387_v21 = vpop.f32.mrb[172].mxu1 }
 0x3f4   :  { %v3388_v49 = vpop.f32.mrb[173].mxu1 }
 0x3f5   :  { %v3389_v14 = vadd.f32 %v3388_v49, %v3387_v21  ;;  %v3390_v3 = vpop.f32.mrb[174].mxu1 }
 0x3f6   :  { %v3391_v38 = vpop.f32.mrb[175].mxu1 }
 0x475   :  { %v3409_v6 = vpop.f32.mrb[176].mxu1 }
 0x476   :  { %v3410_v51 = vpop.f32.mrb[177].mxu1 }
 0x477   :  { %v3411_v29 = vadd.f32 %v3410_v51, %v3409_v6  ;;  %v3412_v42 = vpop.f32.mrb[178].mxu1 }
 0x478   :  { %v3413_v4 = vpop.f32.mrb[179].mxu1 }
 0x479   :  { %v2908_v13 = vadd.f32 %v3411_v29, %v3389_v14 }
 0x47b   :  { %v2913_v44 = vpack.c.bf16 %v2908_v13, %v2908_v13 }
 0x47d   :  { %3579 = vmatmul.mubr.bf16.vlgmr.msra.gmra.mrb[180].mxu1 %v2913_v44 }
 0x550   :  { %v3019_v34 = vpop.f32.mrb[180].mxu1 }
 0x551   :  { %v3020_v46 = vadd.f32 %v3293_v48, %v3019_v34  ;;  %v3580_v27 = vpop.f32.mrb[181].mxu1 }
 0x552   :  { %v3022_v59 = vpop.f32.mrb[182].mxu1 }
 0x553   :  { %3025 = vst [vmem:[%s5162_s7] sm:$0x3] %v3020_v46  ;;  %v3581_v1 = vpop.f32.mrb[183].mxu1 }

</bundles_post_ra>
